<compile_context>
chip_gen: v7x
topology: tpu7x:2x2x1
jax: 0.10.0
libtpu: 0.0.40
codegen_flags: <defaults>
</compile_context>

<pallas_src>
import functools

import jax
import jax.numpy as jnp
from jax import lax
from jax.experimental import pallas as pl
from jax.experimental.pallas import tpu as pltpu


# -----------------------------------------------------------------------------
# Fused Block kernel: one grid step handles a block of `batch_block` batch
# elements end-to-end (LN1 -> MHA -> residual -> LN2 -> FFN -> residual).
# -----------------------------------------------------------------------------
def _block_kernel(x_ref, ln1g_ref, ln1b_ref, wq_ref, wk_ref, wv_ref,
                  wproj_ref, bproj_ref, ln2g_ref, ln2b_ref,
                  w1_ref, b1_ref, w2_ref, b2_ref,
                  out_ref, *attn_refs,
                  num_heads, head_size, is_decoder, eps, batch_block):
    H, hs = num_heads, head_size
    bb = batch_block
    x = x_ref[...]                                   # (bb, T, C)
    _, T, C = x.shape

    def layernorm(v, g, b):
        mu = jnp.mean(v, axis=-1, keepdims=True)
        var = jnp.mean(jnp.square(v - mu), axis=-1, keepdims=True)
        return (v - mu) * lax.rsqrt(var + eps) * g + b

    h1 = layernorm(x, ln1g_ref[...], ln1b_ref[...])  # (bb, T, C)

    wq = wq_ref[...]                                 # (H, C, hs) — C**-0.5 folded in host-side
    wk = wk_ref[...]                                 # (H, C, hs)
    wv = wv_ref[...]                                 # (H, C, hs)
    wproj3 = wproj_ref[...]                          # (H, hs, C)

    # Additive causal bias (0 / -1e30) computed once; diagonal is never masked so the
    # softmax row max stays finite (no inf-inf NaN risk).
    if is_decoder:
        row = lax.broadcasted_iota(jnp.int32, (T, T), 0)
        col = lax.broadcasted_iota(jnp.int32, (T, T), 1)
        add_mask = jnp.where(col <= row, 0.0, jnp.float32(-1e30))   # (T, T)

    dn_qkv = (((2,), (1,)), ((0,), (0,)))    # (H,T,C) x (H,C,hs)  -> (H,T,hs)
    dn_score = (((2,), (2,)), ((0,), (0,)))  # (H,T,hs) x (H,T,hs) -> (H,T,T)  (no k transpose)
    dn_av = (((2,), (1,)), ((0,), (0,)))     # (H,T,T)  x (H,T,hs) -> (H,T,hs)
    dn_proj = (((2,), (1,)), ((0,), (0,)))   # (H,T,hs) x (H,hs,C) -> (H,T,C)

    att_list, wei_list = [], []
    for b in range(bb):                              # static, tiny batch-block loop
        h1_b = jnp.broadcast_to(h1[b][None], (H, T, C))          # (H, T, C)
        q = lax.dot_general(h1_b, wq, dn_qkv, preferred_element_type=jnp.float32)
        k = lax.dot_general(h1_b, wk, dn_qkv, preferred_element_type=jnp.float32)
        v = lax.dot_general(h1_b, wv, dn_qkv, preferred_element_type=jnp.float32)

        s = lax.dot_general(q, k, dn_score, preferred_element_type=jnp.float32)  # (H,T,T)
        if is_decoder:
            s = s + add_mask
        m = jnp.max(s, axis=-1, keepdims=True)
        p = jnp.exp(s - m)
        denom = jnp.sum(p, axis=-1, keepdims=True)
        wei = p * pl.reciprocal(denom, approx=True)               # (H, T, T)
        if attn_refs:
            wei_list.append(wei)

        ho = lax.dot_general(wei, v, dn_av, preferred_element_type=jnp.float32)      # (H,T,hs)
        # Fused concat-heads + output projection: batched matmul then sum over heads.
        pr = lax.dot_general(ho, wproj3, dn_proj, preferred_element_type=jnp.float32)  # (H,T,C)
        att_list.append(jnp.sum(pr, axis=0))                      # (T, C)

    if attn_refs:
        attn_refs[0][...] = jnp.stack(wei_list, axis=0)           # single store, (bb,H,T,T)

    att = jnp.stack(att_list, axis=0) + bproj_ref[...]            # (bb, T, C)
    x1 = x + att                                                  # residual 1

    h2 = layernorm(x1, ln2g_ref[...], ln2b_ref[...])
    h2f = h2.reshape(bb * T, C)                                   # merge leading dims (cheap)
    ff = jnp.maximum(
        jnp.dot(h2f, w1_ref[...], preferred_element_type=jnp.float32) + b1_ref[...], 0.0)
    ff = jnp.dot(ff, w2_ref[...], preferred_element_type=jnp.float32) + b2_ref[...]

    out_ref[...] = x1 + ff.reshape(bb, T, C)                      # residual 2


# -----------------------------------------------------------------------------
# One-time host-side parameter preparation (hoisted out of the per-call path).
# -----------------------------------------------------------------------------
def prepare_block_params(params, n_embd):
    C = n_embd
    H, _, hs = params["wq"].shape
    scale = float(C) ** -0.5                          # module uses c ** -0.5
    f32 = lambda a: jnp.asarray(a, jnp.float32)
    row2d = lambda a: f32(a).reshape(1, -1)
    return dict(
        num_heads=H, head_size=hs,
        ln1_g=row2d(params["ln1_g"]), ln1_b=row2d(params["ln1_b"]),
        ln2_g=row2d(params["ln2_g"]), ln2_b=row2d(params["ln2_b"]),
        wq=f32(params["wq"]) * scale,                 # (H, C, hs), softmax scale folded in
        wk=f32(params["wk"]),                         # (H, C, hs)
        wv=f32(params["wv"]),                         # (H, C, hs)
        wproj=f32(params["wproj"]).reshape(H, hs, C), # (C, C) -> (H, hs, C)
        bproj=row2d(params["bproj"]),
        w1=f32(params["w1"]), b1=row2d(params["b1"]),
        w2=f32(params["w2"]), b2=row2d(params["b2"]),
    )


# -----------------------------------------------------------------------------
# Host wrapper
# -----------------------------------------------------------------------------
def transformer_block(x, prepped, *, is_decoder: bool, return_attn: bool = True,
                      num_batch_blocks=None):
    """
    x       : (B, T, C) float32
    prepped : output of prepare_block_params
    returns out (B, T, C) [, attn (B, H, T, T)]
    """
    B, T, C = x.shape
    H, hs = prepped["num_heads"], prepped["head_size"]

    if num_batch_blocks is None:
        num_batch_blocks = 1                          # single-TC chips: one grid step
        try:
            kind = jax.devices()[0].device_kind.lower()
            if "v7" in kind and B >= 2 and B % 2 == 0:
                num_batch_blocks = 2                  # 2 TCs on v7x: 2-way parallel batch axis
        except Exception:
            pass
    assert B % num_batch_blocks == 0
    bb = B // num_batch_blocks

    flops = (2 * B * T * C * 3 * C                    # q/k/v projections
             + 4 * B * H * T * T * hs                 # q@k^T and wei@v
             + 2 * B * T * C * C                      # output projection
             + 4 * B * T * C * 4 * C)                 # FFN
    transcendentals = B * H * T * T + B * H * T + 2 * B * T
    bytes_accessed = 4 * (2 * B * T * C + 3 * H * C * hs + H * hs * C
                          + 8 * C * C + 14 * C
                          + (B * H * T * T if return_attn else 0))

    kernel = functools.partial(_block_kernel, num_heads=H, head_size=hs,
                               is_decoder=is_decoder, eps=1e-5, batch_block=bb)

    in_specs = [
        pl.BlockSpec((bb, T, C), lambda i: (i, 0, 0)),     # x
        pl.BlockSpec((1, C), lambda i: (0, 0)),            # ln1 gamma
        pl.BlockSpec((1, C), lambda i: (0, 0)),            # ln1 beta
        pl.BlockSpec((H, C, hs), lambda i: (0, 0, 0)),     # wq (resident)
        pl.BlockSpec((H, C, hs), lambda i: (0, 0, 0)),     # wk (resident)
        pl.BlockSpec((H, C, hs), lambda i: (0, 0, 0)),     # wv (resident)
        pl.BlockSpec((H, hs, C), lambda i: (0, 0, 0)),     # wproj (resident)
        pl.BlockSpec((1, C), lambda i: (0, 0)),            # bproj
        pl.BlockSpec((1, C), lambda i: (0, 0)),            # ln2 gamma
        pl.BlockSpec((1, C), lambda i: (0, 0)),            # ln2 beta
        pl.BlockSpec((C, 4 * C), lambda i: (0, 0)),        # w1 (resident)
        pl.BlockSpec((1, 4 * C), lambda i: (0, 0)),        # b1
        pl.BlockSpec((4 * C, C), lambda i: (0, 0)),        # w2 (resident)
        pl.BlockSpec((1, C), lambda i: (0, 0)),            # b2
    ]

    if return_attn:
        out_shape = (jax.ShapeDtypeStruct((B, T, C), jnp.float32),
                     jax.ShapeDtypeStruct((B, H, T, T), jnp.float32))
        out_specs = (pl.BlockSpec((bb, T, C), lambda i: (i, 0, 0)),
                     pl.BlockSpec((bb, H, T, T), lambda i: (i, 0, 0, 0)))
    else:
        out_shape = jax.ShapeDtypeStruct((B, T, C), jnp.float32)
        out_specs = pl.BlockSpec((bb, T, C), lambda i: (i, 0, 0))

    result = pl.pallas_call(
        kernel,
        out_shape=out_shape,
        grid_spec=pltpu.PrefetchScalarGridSpec(
            num_scalar_prefetch=0,
            grid=(num_batch_blocks,),
            in_specs=in_specs,
            out_specs=out_specs,
        ),
        compiler_params=pltpu.CompilerParams(
            dimension_semantics=("parallel",)),
        cost_estimate=pl.CostEstimate(
            flops=flops, transcendentals=transcendentals,
            bytes_accessed=bytes_accessed),
    )(x, prepped["ln1_g"], prepped["ln1_b"], prepped["wq"], prepped["wk"],
      prepped["wv"], prepped["wproj"], prepped["bproj"],
      prepped["ln2_g"], prepped["ln2_b"],
      prepped["w1"], prepped["b1"], prepped["w2"], prepped["b2"])

    return result


# -----------------------------------------------------------------------------
# Pure-JAX reference for sanity checking
# -----------------------------------------------------------------------------
def reference(x, p, *, is_decoder: bool):
    B, T, C = x.shape

    def ln(v, g, b):
        mu = v.mean(-1, keepdims=True)
        var = jnp.square(v - mu).mean(-1, keepdims=True)
        return (v - mu) / jnp.sqrt(var + 1e-5) * g + b

    h = ln(x, p["ln1_g"], p["ln1_b"])
    scale = float(C) ** -0.5
    q = jnp.einsum('btc,hcs->bhts', h, p["wq"])
    k = jnp.einsum('btc,hcs->bhts', h, p["wk"])
    v = jnp.einsum('btc,hcs->bhts', h, p["wv"])
    scores = jnp.einsum('bhts,bhus->bhtu', q, k) * scale
    if is_decoder:
        mask = jnp.tril(jnp.ones((T, T), dtype=bool))
        scores = jnp.where(mask, scores, -jnp.inf)
    wei = jax.nn.softmax(scores, axis=-1)
    head_out = jnp.einsum('bhtu,bhus->bhts', wei, v)
    concat = jnp.transpose(head_out, (0, 2, 1, 3)).reshape(B, T, -1)
    att = concat @ p["wproj"] + p["bproj"]
    x1 = x + att
    h2 = ln(x1, p["ln2_g"], p["ln2_b"])
    ff = jnp.maximum(h2 @ p["w1"] + p["b1"], 0.0) @ p["w2"] + p["b2"]
    return x1 + ff, wei


if __name__ == "__main__":
    # Module-consistent small shapes: n_embd=32, n_head=4 (head_size=8),
    # block_size=16 >= seq, seq=8, batch=2, is_decoder=True.
    B, T, C = 2, 8, 32
    H, HS = 4, 8
    IS_DECODER = True

    key = jax.random.PRNGKey(0)
    keys = jax.random.split(key, 14)

    x = jax.random.normal(keys[0], (B, T, C), dtype=jnp.float32)

    # PyTorch nn.Linear convention is (out, in); generate that way, then transpose.
    wq_pt = jax.random.normal(keys[1], (H, HS, C), dtype=jnp.float32) * 0.1
    wk_pt = jax.random.normal(keys[2], (H, HS, C), dtype=jnp.float32) * 0.1
    wv_pt = jax.random.normal(keys[3], (H, HS, C), dtype=jnp.float32) * 0.1
    wp_pt = jax.random.normal(keys[4], (C, C), dtype=jnp.float32) * 0.1
    w1_pt = jax.random.normal(keys[5], (4 * C, C), dtype=jnp.float32) * 0.1
    w2_pt = jax.random.normal(keys[6], (C, 4 * C), dtype=jnp.float32) * 0.1

    params = dict(
        ln1_g=1.0 + 0.1 * jax.random.normal(keys[7], (C,), dtype=jnp.float32),
        ln1_b=0.1 * jax.random.normal(keys[8], (C,), dtype=jnp.float32),
        ln2_g=1.0 + 0.1 * jax.random.normal(keys[9], (C,), dtype=jnp.float32),
        ln2_b=0.1 * jax.random.normal(keys[10], (C,), dtype=jnp.float32),
        wq=jnp.transpose(wq_pt, (0, 2, 1)),      # (H, C, HS)
        wk=jnp.transpose(wk_pt, (0, 2, 1)),
        wv=jnp.transpose(wv_pt, (0, 2, 1)),
        wproj=wp_pt.T,                            # (C, C) for x @ W
        bproj=0.1 * jax.random.normal(keys[11], (C,), dtype=jnp.float32),
        w1=w1_pt.T,                               # (C, 4C)
        b1=0.1 * jax.random.normal(keys[12], (4 * C,), dtype=jnp.float32),
        w2=w2_pt.T,                               # (4C, C)
        b2=0.1 * jax.random.normal(keys[13], (C,), dtype=jnp.float32),
    )

    prepped = prepare_block_params(params, n_embd=C)   # one-time host-side prep

    out, attn = transformer_block(x, prepped, is_decoder=IS_DECODER, return_attn=True)
    out = jax.block_until_ready(out)
    attn = jax.block_until_ready(attn)

    out_ref, attn_ref = reference(x, params, is_decoder=IS_DECODER)
    assert out.shape == (B, T, C)
    assert attn.shape == (B, H, T, T)
    # approx-reciprocal softmax denominator -> slightly looser tolerance.
    assert jnp.allclose(attn, attn_ref, atol=2e-3, rtol=2e-3)
    assert jnp.allclose(out, out_ref, atol=2e-3, rtol=2e-3)

    # Also exercise the attn-free fast path (caller does not need attention maps).
    out2 = jax.block_until_ready(
        transformer_block(x, prepped, is_decoder=IS_DECODER, return_attn=False))
    assert jnp.allclose(out2, out_ref, atol=2e-3, rtol=2e-3)

    print("KERNEL_OK")
</pallas_src>

<mosaic_0001>
module attributes {stable_mosaic.version = 11 : i64} {
  func.func @_block_kernel(%arg0: i32, %arg1: memref<2x8x32xf32, #tpu.memory_space<vmem>>, %arg2: memref<1x32xf32, #tpu.memory_space<vmem>>, %arg3: memref<1x32xf32, #tpu.memory_space<vmem>>, %arg4: memref<4x32x8xf32, #tpu.memory_space<vmem>>, %arg5: memref<4x32x8xf32, #tpu.memory_space<vmem>>, %arg6: memref<4x32x8xf32, #tpu.memory_space<vmem>>, %arg7: memref<4x8x32xf32, #tpu.memory_space<vmem>>, %arg8: memref<1x32xf32, #tpu.memory_space<vmem>>, %arg9: memref<1x32xf32, #tpu.memory_space<vmem>>, %arg10: memref<1x32xf32, #tpu.memory_space<vmem>>, %arg11: memref<32x128xf32, #tpu.memory_space<vmem>>, %arg12: memref<1x128xf32, #tpu.memory_space<vmem>>, %arg13: memref<128x32xf32, #tpu.memory_space<vmem>>, %arg14: memref<1x32xf32, #tpu.memory_space<vmem>>, %arg15: memref<2x8x32xf32, #tpu.memory_space<vmem>>, %arg16: memref<2x4x8x8xf32, #tpu.memory_space<vmem>>) attributes {dimension_semantics = [#tpu.dimension_semantics<parallel>], iteration_bounds = array<i64: 1>, scalar_prefetch = 0 : i64, scratch_operands = 0 : i64, tpu.core_type = #tpu.core_type<tc>, window_params = [{transform_indices = @transform_0, window_bounds = array<i64: 2, 8, 32>}, {pipeline_mode = #tpu.pipeline_mode<synchronous>, transform_indices = @transform_1, window_bounds = array<i64: 1, 32>}, {pipeline_mode = #tpu.pipeline_mode<synchronous>, transform_indices = @transform_2, window_bounds = array<i64: 1, 32>}, {pipeline_mode = #tpu.pipeline_mode<synchronous>, transform_indices = @transform_3, window_bounds = array<i64: 4, 32, 8>}, {pipeline_mode = #tpu.pipeline_mode<synchronous>, transform_indices = @transform_4, window_bounds = array<i64: 4, 32, 8>}, {pipeline_mode = #tpu.pipeline_mode<synchronous>, transform_indices = @transform_5, window_bounds = array<i64: 4, 32, 8>}, {pipeline_mode = #tpu.pipeline_mode<synchronous>, transform_indices = @transform_6, window_bounds = array<i64: 4, 8, 32>}, {pipeline_mode = #tpu.pipeline_mode<synchronous>, transform_indices = @transform_7, window_bounds = array<i64: 1, 32>}, {pipeline_mode = #tpu.pipeline_mode<synchronous>, transform_indices = @transform_8, window_bounds = array<i64: 1, 32>}, {pipeline_mode = #tpu.pipeline_mode<synchronous>, transform_indices = @transform_9, window_bounds = array<i64: 1, 32>}, {pipeline_mode = #tpu.pipeline_mode<synchronous>, transform_indices = @transform_10, window_bounds = array<i64: 32, 128>}, {pipeline_mode = #tpu.pipeline_mode<synchronous>, transform_indices = @transform_11, window_bounds = array<i64: 1, 128>}, {pipeline_mode = #tpu.pipeline_mode<synchronous>, transform_indices = @transform_12, window_bounds = array<i64: 128, 32>}, {pipeline_mode = #tpu.pipeline_mode<synchronous>, transform_indices = @transform_13, window_bounds = array<i64: 1, 32>}, {transform_indices = @transform_14, window_bounds = array<i64: 2, 8, 32>}, {transform_indices = @transform_15, window_bounds = array<i64: 2, 4, 8, 8>}]} {
    %c0 = arith.constant 0 : index
    %c0_0 = arith.constant 0 : index
    %c0_1 = arith.constant 0 : index
    %0 = vector.load %arg1[%c0, %c0_0, %c0_1] : memref<2x8x32xf32, #tpu.memory_space<vmem>>, vector<2x8x32xf32>
    %c0_2 = arith.constant 0 : index
    %c0_3 = arith.constant 0 : index
    %1 = vector.load %arg2[%c0_2, %c0_3] : memref<1x32xf32, #tpu.memory_space<vmem>>, vector<1x32xf32>
    %c0_4 = arith.constant 0 : index
    %c0_5 = arith.constant 0 : index
    %2 = vector.load %arg3[%c0_4, %c0_5] : memref<1x32xf32, #tpu.memory_space<vmem>>, vector<1x32xf32>
    %cst = arith.constant dense<0.000000e+00> : vector<2x8xf32>
    %3 = vector.multi_reduction <add>, %0, %cst [2] : vector<2x8x32xf32> to vector<2x8xf32>
    %4 = vector.shape_cast %3 : vector<2x8xf32> to vector<2x8x1xf32>
    %cst_6 = arith.constant 3.200000e+01 : f32
    %5 = vector.broadcast %cst_6 : f32 to vector<2x8x1xf32>
    %6 = arith.divf %4, %5 : vector<2x8x1xf32>
    %7 = vector.broadcast %6 : vector<2x8x1xf32> to vector<2x8x32xf32>
    %8 = arith.subf %0, %7 : vector<2x8x32xf32>
    %9 = arith.mulf %8, %8 : vector<2x8x32xf32>
    %cst_7 = arith.constant dense<0.000000e+00> : vector<2x8xf32>
    %10 = vector.multi_reduction <add>, %9, %cst_7 [2] : vector<2x8x32xf32> to vector<2x8xf32>
    %11 = vector.shape_cast %10 : vector<2x8xf32> to vector<2x8x1xf32>
    %cst_8 = arith.constant 3.200000e+01 : f32
    %12 = vector.broadcast %cst_8 : f32 to vector<2x8x1xf32>
    %13 = arith.divf %11, %12 : vector<2x8x1xf32>
    %14 = vector.broadcast %6 : vector<2x8x1xf32> to vector<2x8x32xf32>
    %15 = arith.subf %0, %14 : vector<2x8x32xf32>
    %cst_9 = arith.constant 9.99999974E-6 : f32
    %16 = vector.broadcast %cst_9 : f32 to vector<2x8x1xf32>
    %17 = arith.addf %13, %16 : vector<2x8x1xf32>
    %18 = math.rsqrt %17 : vector<2x8x1xf32>
    %19 = vector.broadcast %18 : vector<2x8x1xf32> to vector<2x8x32xf32>
    %20 = arith.mulf %15, %19 : vector<2x8x32xf32>
    %21 = vector.shape_cast %1 : vector<1x32xf32> to vector<1x1x32xf32>
    %22 = vector.broadcast %21 : vector<1x1x32xf32> to vector<2x8x32xf32>
    %23 = arith.mulf %20, %22 : vector<2x8x32xf32>
    %24 = vector.shape_cast %2 : vector<1x32xf32> to vector<1x1x32xf32>
    %25 = vector.broadcast %24 : vector<1x1x32xf32> to vector<2x8x32xf32>
    %26 = arith.addf %23, %25 : vector<2x8x32xf32>
    %c0_10 = arith.constant 0 : index
    %c0_11 = arith.constant 0 : index
    %c0_12 = arith.constant 0 : index
    %27 = vector.load %arg4[%c0_10, %c0_11, %c0_12] : memref<4x32x8xf32, #tpu.memory_space<vmem>>, vector<4x32x8xf32>
    %c0_13 = arith.constant 0 : index
    %c0_14 = arith.constant 0 : index
    %c0_15 = arith.constant 0 : index
    %28 = vector.load %arg5[%c0_13, %c0_14, %c0_15] : memref<4x32x8xf32, #tpu.memory_space<vmem>>, vector<4x32x8xf32>
    %c0_16 = arith.constant 0 : index
    %c0_17 = arith.constant 0 : index
    %c0_18 = arith.constant 0 : index
    %29 = vector.load %arg6[%c0_16, %c0_17, %c0_18] : memref<4x32x8xf32, #tpu.memory_space<vmem>>, vector<4x32x8xf32>
    %c0_19 = arith.constant 0 : index
    %c0_20 = arith.constant 0 : index
    %c0_21 = arith.constant 0 : index
    %30 = vector.load %arg7[%c0_19, %c0_20, %c0_21] : memref<4x8x32xf32, #tpu.memory_space<vmem>>, vector<4x8x32xf32>
    %31 = tpu.iota {dimensions = array<i32: 0>} : vector<8x8xi32>
    %32 = tpu.iota {dimensions = array<i32: 1>} : vector<8x8xi32>
    %33 = arith.cmpi sle, %32, %31 : vector<8x8xi32>
    %cst_22 = arith.constant 0.000000e+00 : f32
    %cst_23 = arith.constant -1.000000e+30 : f32
    %34 = vector.broadcast %cst_22 : f32 to vector<8x8xf32>
    %35 = vector.broadcast %cst_23 : f32 to vector<8x8xf32>
    %36 = arith.select %33, %34, %35 : vector<8x8xi1>, vector<8x8xf32>
    %37 = vector.extract_strided_slice %26 {offsets = [0, 0, 0], sizes = [1, 8, 32], strides = [1, 1, 1]} : vector<2x8x32xf32> to vector<1x8x32xf32>
    %38 = vector.shape_cast %37 : vector<1x8x32xf32> to vector<8x32xf32>
    %39 = vector.shape_cast %38 : vector<8x32xf32> to vector<1x8x32xf32>
    %40 = vector.shape_cast %39 : vector<1x8x32xf32> to vector<1x8x32xf32>
    %41 = vector.broadcast %40 : vector<1x8x32xf32> to vector<4x8x32xf32>
    %cst_24 = arith.constant dense<0.000000e+00> : vector<4x8x8xf32>
    %42 = tpu.matmul %41, %27, %cst_24 {dimension_numbers = #tpu.dot_dimension_numbers<[2], [1], [1], [2], [0, 0, 0, 1, 1, 2], [0], [0]>} : vector<4x8x32xf32>, vector<4x32x8xf32>, vector<4x8x8xf32> -> vector<4x8x8xf32>
    %cst_25 = arith.constant dense<0.000000e+00> : vector<4x8x8xf32>
    %43 = tpu.matmul %41, %28, %cst_25 {dimension_numbers = #tpu.dot_dimension_numbers<[2], [1], [1], [2], [0, 0, 0, 1, 1, 2], [0], [0]>} : vector<4x8x32xf32>, vector<4x32x8xf32>, vector<4x8x8xf32> -> vector<4x8x8xf32>
    %cst_26 = arith.constant dense<0.000000e+00> : vector<4x8x8xf32>
    %44 = tpu.matmul %41, %29, %cst_26 {dimension_numbers = #tpu.dot_dimension_numbers<[2], [1], [1], [2], [0, 0, 0, 1, 1, 2], [0], [0]>} : vector<4x8x32xf32>, vector<4x32x8xf32>, vector<4x8x8xf32> -> vector<4x8x8xf32>
    %cst_27 = arith.constant dense<0.000000e+00> : vector<4x8x8xf32>
    %45 = tpu.matmul %42, %43, %cst_27 {dimension_numbers = #tpu.dot_dimension_numbers<[2], [2], [1], [1], [0, 0, 0, 1, 1, 1], [0], [0]>} : vector<4x8x8xf32>, vector<4x8x8xf32>, vector<4x8x8xf32> -> vector<4x8x8xf32>
    %46 = vector.shape_cast %36 : vector<8x8xf32> to vector<1x8x8xf32>
    %47 = vector.broadcast %46 : vector<1x8x8xf32> to vector<4x8x8xf32>
    %48 = arith.addf %45, %47 : vector<4x8x8xf32>
    %cst_28 = arith.constant dense<0xFF800000> : vector<4x8xf32>
    %49 = vector.multi_reduction <maximumf>, %48, %cst_28 [2] : vector<4x8x8xf32> to vector<4x8xf32>
    %50 = vector.shape_cast %49 : vector<4x8xf32> to vector<4x8x1xf32>
    %51 = vector.broadcast %50 : vector<4x8x1xf32> to vector<4x8x8xf32>
    %52 = arith.subf %48, %51 : vector<4x8x8xf32>
    %53 = math.exp %52 : vector<4x8x8xf32>
    %cst_29 = arith.constant dense<0.000000e+00> : vector<4x8xf32>
    %54 = vector.multi_reduction <add>, %53, %cst_29 [2] : vector<4x8x8xf32> to vector<4x8xf32>
    %55 = vector.shape_cast %54 : vector<4x8xf32> to vector<4x8x1xf32>
    %56 = tpu.reciprocal %55 {approx = true} : vector<4x8x1xf32> -> vector<4x8x1xf32>
    %57 = vector.broadcast %56 : vector<4x8x1xf32> to vector<4x8x8xf32>
    %58 = arith.mulf %53, %57 : vector<4x8x8xf32>
    %cst_30 = arith.constant dense<0.000000e+00> : vector<4x8x8xf32>
    %59 = tpu.matmul %58, %44, %cst_30 {dimension_numbers = #tpu.dot_dimension_numbers<[2], [1], [1], [2], [0, 0, 0, 1, 1, 2], [0], [0]>} : vector<4x8x8xf32>, vector<4x8x8xf32>, vector<4x8x8xf32> -> vector<4x8x8xf32>
    %cst_31 = arith.constant dense<0.000000e+00> : vector<4x8x32xf32>
    %60 = tpu.matmul %59, %30, %cst_31 {dimension_numbers = #tpu.dot_dimension_numbers<[2], [1], [1], [2], [0, 0, 0, 1, 1, 2], [0], [0]>} : vector<4x8x8xf32>, vector<4x8x32xf32>, vector<4x8x32xf32> -> vector<4x8x32xf32>
    %cst_32 = arith.constant dense<0.000000e+00> : vector<8x32xf32>
    %61 = vector.multi_reduction <add>, %60, %cst_32 [0] : vector<4x8x32xf32> to vector<8x32xf32>
    %62 = vector.extract_strided_slice %26 {offsets = [1, 0, 0], sizes = [1, 8, 32], strides = [1, 1, 1]} : vector<2x8x32xf32> to vector<1x8x32xf32>
    %63 = vector.shape_cast %62 : vector<1x8x32xf32> to vector<8x32xf32>
    %64 = vector.shape_cast %63 : vector<8x32xf32> to vector<1x8x32xf32>
    %65 = vector.shape_cast %64 : vector<1x8x32xf32> to vector<1x8x32xf32>
    %66 = vector.broadcast %65 : vector<1x8x32xf32> to vector<4x8x32xf32>
    %cst_33 = arith.constant dense<0.000000e+00> : vector<4x8x8xf32>
    %67 = tpu.matmul %66, %27, %cst_33 {dimension_numbers = #tpu.dot_dimension_numbers<[2], [1], [1], [2], [0, 0, 0, 1, 1, 2], [0], [0]>} : vector<4x8x32xf32>, vector<4x32x8xf32>, vector<4x8x8xf32> -> vector<4x8x8xf32>
    %cst_34 = arith.constant dense<0.000000e+00> : vector<4x8x8xf32>
    %68 = tpu.matmul %66, %28, %cst_34 {dimension_numbers = #tpu.dot_dimension_numbers<[2], [1], [1], [2], [0, 0, 0, 1, 1, 2], [0], [0]>} : vector<4x8x32xf32>, vector<4x32x8xf32>, vector<4x8x8xf32> -> vector<4x8x8xf32>
    %cst_35 = arith.constant dense<0.000000e+00> : vector<4x8x8xf32>
    %69 = tpu.matmul %66, %29, %cst_35 {dimension_numbers = #tpu.dot_dimension_numbers<[2], [1], [1], [2], [0, 0, 0, 1, 1, 2], [0], [0]>} : vector<4x8x32xf32>, vector<4x32x8xf32>, vector<4x8x8xf32> -> vector<4x8x8xf32>
    %cst_36 = arith.constant dense<0.000000e+00> : vector<4x8x8xf32>
    %70 = tpu.matmul %67, %68, %cst_36 {dimension_numbers = #tpu.dot_dimension_numbers<[2], [2], [1], [1], [0, 0, 0, 1, 1, 1], [0], [0]>} : vector<4x8x8xf32>, vector<4x8x8xf32>, vector<4x8x8xf32> -> vector<4x8x8xf32>
    %71 = vector.shape_cast %36 : vector<8x8xf32> to vector<1x8x8xf32>
    %72 = vector.broadcast %71 : vector<1x8x8xf32> to vector<4x8x8xf32>
    %73 = arith.addf %70, %72 : vector<4x8x8xf32>
    %cst_37 = arith.constant dense<0xFF800000> : vector<4x8xf32>
    %74 = vector.multi_reduction <maximumf>, %73, %cst_37 [2] : vector<4x8x8xf32> to vector<4x8xf32>
    %75 = vector.shape_cast %74 : vector<4x8xf32> to vector<4x8x1xf32>
    %76 = vector.broadcast %75 : vector<4x8x1xf32> to vector<4x8x8xf32>
    %77 = arith.subf %73, %76 : vector<4x8x8xf32>
    %78 = math.exp %77 : vector<4x8x8xf32>
    %cst_38 = arith.constant dense<0.000000e+00> : vector<4x8xf32>
    %79 = vector.multi_reduction <add>, %78, %cst_38 [2] : vector<4x8x8xf32> to vector<4x8xf32>
    %80 = vector.shape_cast %79 : vector<4x8xf32> to vector<4x8x1xf32>
    %81 = tpu.reciprocal %80 {approx = true} : vector<4x8x1xf32> -> vector<4x8x1xf32>
    %82 = vector.broadcast %81 : vector<4x8x1xf32> to vector<4x8x8xf32>
    %83 = arith.mulf %78, %82 : vector<4x8x8xf32>
    %cst_39 = arith.constant dense<0.000000e+00> : vector<4x8x8xf32>
    %84 = tpu.matmul %83, %69, %cst_39 {dimension_numbers = #tpu.dot_dimension_numbers<[2], [1], [1], [2], [0, 0, 0, 1, 1, 2], [0], [0]>} : vector<4x8x8xf32>, vector<4x8x8xf32>, vector<4x8x8xf32> -> vector<4x8x8xf32>
    %cst_40 = arith.constant dense<0.000000e+00> : vector<4x8x32xf32>
    %85 = tpu.matmul %84, %30, %cst_40 {dimension_numbers = #tpu.dot_dimension_numbers<[2], [1], [1], [2], [0, 0, 0, 1, 1, 2], [0], [0]>} : vector<4x8x8xf32>, vector<4x8x32xf32>, vector<4x8x32xf32> -> vector<4x8x32xf32>
    %cst_41 = arith.constant dense<0.000000e+00> : vector<8x32xf32>
    %86 = vector.multi_reduction <add>, %85, %cst_41 [0] : vector<4x8x32xf32> to vector<8x32xf32>
    %87 = vector.shape_cast %58 : vector<4x8x8xf32> to vector<1x4x8x8xf32>
    %88 = vector.shape_cast %83 : vector<4x8x8xf32> to vector<1x4x8x8xf32>
    %89 = tpu.concatenate %87, %88 in 0 : vector<1x4x8x8xf32>, vector<1x4x8x8xf32> -> vector<2x4x8x8xf32>
    %c0_42 = arith.constant 0 : index
    %c0_43 = arith.constant 0 : index
    %c0_44 = arith.constant 0 : index
    %c0_45 = arith.constant 0 : index
    %90 = vector.load %arg16[%c0_42, %c0_43, %c0_44, %c0_45] : memref<2x4x8x8xf32, #tpu.memory_space<vmem>>, vector<2x4x8x8xf32>
    tpu.vector_store %arg16[%c0_42, %c0_43, %c0_44, %c0_45], %89 {strides = array<i32>} : memref<2x4x8x8xf32, #tpu.memory_space<vmem>>, vector<2x4x8x8xf32>,
    %91 = vector.shape_cast %61 : vector<8x32xf32> to vector<1x8x32xf32>
    %92 = vector.shape_cast %86 : vector<8x32xf32> to vector<1x8x32xf32>
    %93 = tpu.concatenate %91, %92 in 0 : vector<1x8x32xf32>, vector<1x8x32xf32> -> vector<2x8x32xf32>
    %c0_46 = arith.constant 0 : index
    %c0_47 = arith.constant 0 : index
    %94 = vector.load %arg8[%c0_46, %c0_47] : memref<1x32xf32, #tpu.memory_space<vmem>>, vector<1x32xf32>
    %95 = vector.shape_cast %94 : vector<1x32xf32> to vector<1x1x32xf32>
    %96 = vector.broadcast %95 : vector<1x1x32xf32> to vector<2x8x32xf32>
    %97 = arith.addf %93, %96 : vector<2x8x32xf32>
    %98 = arith.addf %0, %97 : vector<2x8x32xf32>
    %c0_48 = arith.constant 0 : index
    %c0_49 = arith.constant 0 : index
    %99 = vector.load %arg9[%c0_48, %c0_49] : memref<1x32xf32, #tpu.memory_space<vmem>>, vector<1x32xf32>
    %c0_50 = arith.constant 0 : index
    %c0_51 = arith.constant 0 : index
    %100 = vector.load %arg10[%c0_50, %c0_51] : memref<1x32xf32, #tpu.memory_space<vmem>>, vector<1x32xf32>
    %cst_52 = arith.constant dense<0.000000e+00> : vector<2x8xf32>
    %101 = vector.multi_reduction <add>, %98, %cst_52 [2] : vector<2x8x32xf32> to vector<2x8xf32>
    %102 = vector.shape_cast %101 : vector<2x8xf32> to vector<2x8x1xf32>
    %cst_53 = arith.constant 3.200000e+01 : f32
    %103 = vector.broadcast %cst_53 : f32 to vector<2x8x1xf32>
    %104 = arith.divf %102, %103 : vector<2x8x1xf32>
    %105 = vector.broadcast %104 : vector<2x8x1xf32> to vector<2x8x32xf32>
    %106 = arith.subf %98, %105 : vector<2x8x32xf32>
    %107 = arith.mulf %106, %106 : vector<2x8x32xf32>
    %cst_54 = arith.constant dense<0.000000e+00> : vector<2x8xf32>
    %108 = vector.multi_reduction <add>, %107, %cst_54 [2] : vector<2x8x32xf32> to vector<2x8xf32>
    %109 = vector.shape_cast %108 : vector<2x8xf32> to vector<2x8x1xf32>
    %cst_55 = arith.constant 3.200000e+01 : f32
    %110 = vector.broadcast %cst_55 : f32 to vector<2x8x1xf32>
    %111 = arith.divf %109, %110 : vector<2x8x1xf32>
    %112 = vector.broadcast %104 : vector<2x8x1xf32> to vector<2x8x32xf32>
    %113 = arith.subf %98, %112 : vector<2x8x32xf32>
    %cst_56 = arith.constant 9.99999974E-6 : f32
    %114 = vector.broadcast %cst_56 : f32 to vector<2x8x1xf32>
    %115 = arith.addf %111, %114 : vector<2x8x1xf32>
    %116 = math.rsqrt %115 : vector<2x8x1xf32>
    %117 = vector.broadcast %116 : vector<2x8x1xf32> to vector<2x8x32xf32>
    %118 = arith.mulf %113, %117 : vector<2x8x32xf32>
    %119 = vector.shape_cast %99 : vector<1x32xf32> to vector<1x1x32xf32>
    %120 = vector.broadcast %119 : vector<1x1x32xf32> to vector<2x8x32xf32>
    %121 = arith.mulf %118, %120 : vector<2x8x32xf32>
    %122 = vector.shape_cast %100 : vector<1x32xf32> to vector<1x1x32xf32>
    %123 = vector.broadcast %122 : vector<1x1x32xf32> to vector<2x8x32xf32>
    %124 = arith.addf %121, %123 : vector<2x8x32xf32>
    %125 = vector.shape_cast %124 : vector<2x8x32xf32> to vector<16x32xf32>
    %c0_57 = arith.constant 0 : index
    %c0_58 = arith.constant 0 : index
    %126 = vector.load %arg11[%c0_57, %c0_58] : memref<32x128xf32, #tpu.memory_space<vmem>>, vector<32x128xf32>
    %cst_59 = arith.constant dense<0.000000e+00> : vector<16x128xf32>
    %127 = tpu.matmul %125, %126, %cst_59 {dimension_numbers = #tpu.dot_dimension_numbers<[1], [0], [0], [1], [0, 0, 1, 1], [], []>} : vector<16x32xf32>, vector<32x128xf32>, vector<16x128xf32> -> vector<16x128xf32>
    %c0_60 = arith.constant 0 : index
    %c0_61 = arith.constant 0 : index
    %128 = vector.load %arg12[%c0_60, %c0_61] : memref<1x128xf32, #tpu.memory_space<vmem>>, vector<1x128xf32>
    %129 = vector.broadcast %128 : vector<1x128xf32> to vector<16x128xf32>
    %130 = arith.addf %127, %129 : vector<16x128xf32>
    %cst_62 = arith.constant 0.000000e+00 : f32
    %131 = vector.broadcast %cst_62 : f32 to vector<16x128xf32>
    %132 = arith.maximumf %130, %131 : vector<16x128xf32>
    %c0_63 = arith.constant 0 : index
    %c0_64 = arith.constant 0 : index
    %133 = vector.load %arg13[%c0_63, %c0_64] : memref<128x32xf32, #tpu.memory_space<vmem>>, vector<128x32xf32>
    %cst_65 = arith.constant dense<0.000000e+00> : vector<16x32xf32>
    %134 = tpu.matmul %132, %133, %cst_65 {dimension_numbers = #tpu.dot_dimension_numbers<[1], [0], [0], [1], [0, 0, 1, 1], [], []>} : vector<16x128xf32>, vector<128x32xf32>, vector<16x32xf32> -> vector<16x32xf32>
    %c0_66 = arith.constant 0 : index
    %c0_67 = arith.constant 0 : index
    %135 = vector.load %arg14[%c0_66, %c0_67] : memref<1x32xf32, #tpu.memory_space<vmem>>, vector<1x32xf32>
    %136 = vector.broadcast %135 : vector<1x32xf32> to vector<16x32xf32>
    %137 = arith.addf %134, %136 : vector<16x32xf32>
    %138 = vector.shape_cast %137 : vector<16x32xf32> to vector<2x8x32xf32>
    %139 = arith.addf %98, %138 : vector<2x8x32xf32>
    %c0_68 = arith.constant 0 : index
    %c0_69 = arith.constant 0 : index
    %c0_70 = arith.constant 0 : index
    %140 = vector.load %arg15[%c0_68, %c0_69, %c0_70] : memref<2x8x32xf32, #tpu.memory_space<vmem>>, vector<2x8x32xf32>
    tpu.vector_store %arg15[%c0_68, %c0_69, %c0_70], %139 {strides = array<i32>} : memref<2x8x32xf32, #tpu.memory_space<vmem>>, vector<2x8x32xf32>,
    return
  }
  func.func @transform_0(%arg0: i32) -> (i32, i32, i32) {
    %c0_i32 = arith.constant 0 : i32
    %c0_i32_0 = arith.constant 0 : i32
    %c0_i32_1 = arith.constant 0 : i32
    return %arg0, %c0_i32, %c0_i32_0 : i32, i32, i32
  }
  func.func @transform_1(%arg0: i32) -> (i32, i32) {
    %c0_i32 = arith.constant 0 : i32
    %c0_i32_0 = arith.constant 0 : i32
    %c0_i32_1 = arith.constant 0 : i32
    return %c0_i32, %c0_i32_0 : i32, i32
  }
  func.func @transform_2(%arg0: i32) -> (i32, i32) {
    %c0_i32 = arith.constant 0 : i32
    %c0_i32_0 = arith.constant 0 : i32
    %c0_i32_1 = arith.constant 0 : i32
    return %c0_i32, %c0_i32_0 : i32, i32
  }
  func.func @transform_3(%arg0: i32) -> (i32, i32, i32) {
    %c0_i32 = arith.constant 0 : i32
    %c0_i32_0 = arith.constant 0 : i32
    %c0_i32_1 = arith.constant 0 : i32
    %c0_i32_2 = arith.constant 0 : i32
    return %c0_i32, %c0_i32_0, %c0_i32_1 : i32, i32, i32
  }
  func.func @transform_4(%arg0: i32) -> (i32, i32, i32) {
    %c0_i32 = arith.constant 0 : i32
    %c0_i32_0 = arith.constant 0 : i32
    %c0_i32_1 = arith.constant 0 : i32
    %c0_i32_2 = arith.constant 0 : i32
    return %c0_i32, %c0_i32_0, %c0_i32_1 : i32, i32, i32
  }
  func.func @transform_5(%arg0: i32) -> (i32, i32, i32) {
    %c0_i32 = arith.constant 0 : i32
    %c0_i32_0 = arith.constant 0 : i32
    %c0_i32_1 = arith.constant 0 : i32
    %c0_i32_2 = arith.constant 0 : i32
    return %c0_i32, %c0_i32_0, %c0_i32_1 : i32, i32, i32
  }
  func.func @transform_6(%arg0: i32) -> (i32, i32, i32) {
    %c0_i32 = arith.constant 0 : i32
    %c0_i32_0 = arith.constant 0 : i32
    %c0_i32_1 = arith.constant 0 : i32
    %c0_i32_2 = arith.constant 0 : i32
    return %c0_i32, %c0_i32_0, %c0_i32_1 : i32, i32, i32
  }
  func.func @transform_7(%arg0: i32) -> (i32, i32) {
    %c0_i32 = arith.constant 0 : i32
    %c0_i32_0 = arith.constant 0 : i32
    %c0_i32_1 = arith.constant 0 : i32
    return %c0_i32, %c0_i32_0 : i32, i32
  }
  func.func @transform_8(%arg0: i32) -> (i32, i32) {
    %c0_i32 = arith.constant 0 : i32
    %c0_i32_0 = arith.constant 0 : i32
    %c0_i32_1 = arith.constant 0 : i32
    return %c0_i32, %c0_i32_0 : i32, i32
  }
  func.func @transform_9(%arg0: i32) -> (i32, i32) {
    %c0_i32 = arith.constant 0 : i32
    %c0_i32_0 = arith.constant 0 : i32
    %c0_i32_1 = arith.constant 0 : i32
    return %c0_i32, %c0_i32_0 : i32, i32
  }
  func.func @transform_10(%arg0: i32) -> (i32, i32) {
    %c0_i32 = arith.constant 0 : i32
    %c0_i32_0 = arith.constant 0 : i32
    %c0_i32_1 = arith.constant 0 : i32
    return %c0_i32, %c0_i32_0 : i32, i32
  }
  func.func @transform_11(%arg0: i32) -> (i32, i32) {
    %c0_i32 = arith.constant 0 : i32
    %c0_i32_0 = arith.constant 0 : i32
    %c0_i32_1 = arith.constant 0 : i32
    return %c0_i32, %c0_i32_0 : i32, i32
  }
  func.func @transform_12(%arg0: i32) -> (i32, i32) {
    %c0_i32 = arith.constant 0 : i32
    %c0_i32_0 = arith.constant 0 : i32
    %c0_i32_1 = arith.constant 0 : i32
    return %c0_i32, %c0_i32_0 : i32, i32
  }
  func.func @transform_13(%arg0: i32) -> (i32, i32) {
    %c0_i32 = arith.constant 0 : i32
    %c0_i32_0 = arith.constant 0 : i32
    %c0_i32_1 = arith.constant 0 : i32
    return %c0_i32, %c0_i32_0 : i32, i32
  }
  func.func @transform_14(%arg0: i32) -> (i32, i32, i32) {
    %c0_i32 = arith.constant 0 : i32
    %c0_i32_0 = arith.constant 0 : i32
    %c0_i32_1 = arith.constant 0 : i32
    return %arg0, %c0_i32, %c0_i32_0 : i32, i32, i32
  }
  func.func @transform_15(%arg0: i32) -> (i32, i32, i32, i32) {
    %c0_i32 = arith.constant 0 : i32
    %c0_i32_0 = arith.constant 0 : i32
    %c0_i32_1 = arith.constant 0 : i32
    %c0_i32_2 = arith.constant 0 : i32
    return %arg0, %c0_i32, %c0_i32_0, %c0_i32_1 : i32, i32, i32, i32
  }
}

</mosaic_0001>

<bundles_post_ra>
// kernel: tpu_custom_call.1
= control target key start
LH: loop header
LB: loop body
LE: loop exit
PB: predicated region body
PF: predicated region fallthrough
CT: control target
= control target key end

     0   :  { %21 = vsyncpa [#allocation3], 0  ;;  %vm55_vm0 = vcmask 261120   ;;  %s5813_s0 = inlined_call_operand.vmem [shape: f32[2,8,32], index: 0, kind: input, shape index: {}]   ;;  %s5814_s1 = inlined_call_operand.vmem [shape: f32[1,32], index: 1, kind: input, shape index: {}]   ;;  %s5815_s2 = inlined_call_operand.vmem [shape: f32[1,32], index: 2, kind: input, shape index: {}]   ;;  %s5816_s3 = inlined_call_operand.vmem [shape: f32[4,32,8], index: 3, kind: input, shape index: {}]   ;;  %s5817_s4 = inlined_call_operand.vmem [shape: f32[4,32,8], index: 4, kind: input, shape index: {}]   ;;  %s5818_s5 = inlined_call_operand.vmem [shape: f32[4,32,8], index: 5, kind: input, shape index: {}]   ;;  %s5819_s6 = inlined_call_operand.vmem [shape: f32[4,8,32], index: 6, kind: input, shape index: {}]   ;;  %s5820_s7 = inlined_call_operand.vmem [shape: f32[1,32], index: 7, kind: input, shape index: {}]   ;;  %s5821_s8 = inlined_call_operand.vmem [shape: f32[1,32], index: 8, kind: input, shape index: {}]   ;;  %s5822_s9 = inlined_call_operand.vmem [shape: f32[1,32], index: 9, kind: input, shape index: {}]   ;;  %s5823_s10 = inlined_call_operand.vmem [shape: f32[32,128], index: 10, kind: input, shape index: {}]   ;;  %s5824_s11 = inlined_call_operand.vmem [shape: f32[1,128], index: 11, kind: input, shape index: {}]   ;;  %s5825_s12 = inlined_call_operand.vmem [shape: f32[128,32], index: 12, kind: input, shape index: {}]   ;;  %s5826_s13 = inlined_call_operand.vmem [shape: f32[1,32], index: 13, kind: input, shape index: {}]   ;;  %s5827_s14 = inlined_call_operand.hbm [shape: f32[2,8,32], index: 14, kind: output, shape index: {0}]   ;;  %s5828_s15 = inlined_call_operand.hbm [shape: f32[2,4,8,8], index: 15, kind: output, shape index: {1}]  }
   0x1   :  { %v51_v0 = vld [vmem:[%s5813_s0] sm:$0xff] }
   0x2   :  { %22 = vsyncpa [#allocation5], 0  ;;  %v56_v1 = vsel %vm55_vm0, %v51_v0, 0.0  ;;  %v99_v7 = vld [vmem:[%s5816_s3] sm:$0xff]  ;;  %v100_v8 = vld [vmem:[%s5816_s3 + $0x8] sm:$0xff]  ;;  %v4981_v12 = vmov 0.0|0.0  }
   0x3   :  { %57 = vadd.xlane.f32.xlu0 %v56_v1  ;;  %v111_v9 = vld [vmem:[%s5816_s3 + $0x60] sm:$0xff]  ;;  %v5083_v10 = vpack.c.bf16 %v100_v8, %v99_v7  ;;  %v112_v11 = vld [vmem:[%s5816_s3 + $0x68] sm:$0xff]  ;;  %4700 = vmatprep.subr.bf16.mxu0 %v4981_v12  ;;  %v101_v14 = vld [vmem:[%s5816_s3 + $0x10] sm:$0xff]  ;;  %vm4982_vm1 = vmmov 0   ;;  %v4983_v20 = vmov 0.0   ;;  %vm1000_vm2 = vcmask 64512  }
   0x4   :  { %4718 = vmatprep.subr.bf16.mxu1 %v4981_v12  ;;  %v5090_v13 = vpack.c.bf16 %v112_v11, %v111_v9  ;;  %v102_v15 = vld [vmem:[%s5816_s3 + $0x18] sm:$0xff]  ;;  %v113_v16 = vld [vmem:[%s5816_s3 + $0x70] sm:$0xff]  ;;  %4278 = vmatprep.mubr.msk.f32.mxu0 %vm4982_vm1, %v4983_v20  ;;  %v5123_v25 = vld [vmem:[%s5814_s1] ss:$0 sm:$0xff] }
   0x5   :  { %4702 = vmatpush3.bf16.msra.mxu0 %v5083_v10  ;;  %v5105_v17 = vpack.c.bf16 %v102_v15, %v101_v14  ;;  %v114_v18 = vld [vmem:[%s5816_s3 + $0x78] sm:$0xff]  ;;  %4311 = vmatprep.mubr.msk.f32.mxu1 %vm4982_vm1, %v4983_v20  ;;  %v103_v26 = vld [vmem:[%s5816_s3 + $0x20] sm:$0xff]  ;;  %v104_v28 = vld [vmem:[%s5816_s3 + $0x28] sm:$0xff] }
   0x6   :  { %4720 = vmatpush3.bf16.msra.mxu1 %v5090_v13  ;;  %4703 = vmatprep.subr.bf16.mxu0 %v4981_v12  ;;  %v5110_v19 = vpack.c.bf16 %v114_v18, %v113_v16  ;;  %v119_v29 = vld [vmem:[%s5817_s4 + $0x20] sm:$0xff]  ;;  %v120_v30 = vld [vmem:[%s5817_s4 + $0x28] sm:$0xff]  ;;  %v5143_v33 = vpack.c.bf16 %v104_v28, %v103_v26  ;;  %v105_v35 = vld [vmem:[%s5816_s3 + $0x30] sm:$0xff] }
   0x7   :  { %4721 = vmatprep.subr.bf16.mxu1 %v4981_v12  ;;  %v5140_v31 = vld [vmem:[%s5815_s2] ss:$0 sm:$0xff]  ;;  %v5145_v34 = vpack.c.bf16 %v120_v30, %v119_v29  ;;  %v106_v37 = vld [vmem:[%s5816_s3 + $0x38] sm:$0xff]  ;;  %v121_v38 = vld [vmem:[%s5817_s4 + $0x30] sm:$0xff] }
   0x8   :  { %v122_v39 = vld [vmem:[%s5817_s4 + $0x38] sm:$0xff]  ;;  %v5168_v40 = vpack.c.bf16 %v106_v37, %v105_v35  ;;  %v107_v42 = vld [vmem:[%s5816_s3 + $0x40] sm:$0xff]  ;;  %v108_v43 = vld [vmem:[%s5816_s3 + $0x48] sm:$0xff] }
   0x9   :  { %4705 = vmatpush3.bf16.msra.mxu0 %v5105_v17  ;;  %v5170_v41 = vpack.c.bf16 %v122_v39, %v121_v38  ;;  %v127_v44 = vld [vmem:[%s5817_s4 + $0x60] sm:$0xff]  ;;  %v128_v45 = vld [vmem:[%s5817_s4 + $0x68] sm:$0xff]  ;;  %v5192_v46 = vpack.c.bf16 %v108_v43, %v107_v42  ;;  %v109_v48 = vld [vmem:[%s5816_s3 + $0x50] sm:$0xff] }
   0xa   :  { %4723 = vmatpush3.bf16.msra.mxu1 %v5110_v19  ;;  %4706 = vmatprep.subr.bf16.mxu0 %v4981_v12  ;;  %v5194_v47 = vpack.c.bf16 %v128_v45, %v127_v44  ;;  %v110_v49 = vld [vmem:[%s5816_s3 + $0x58] sm:$0xff]  ;;  %v129_v50 = vld [vmem:[%s5817_s4 + $0x70] sm:$0xff]  ;;  %v115_v54 = vld [vmem:[%s5817_s4] sm:$0xff] }
   0xb   :  { %4730 = vmatprep.subr.bf16.mxu1 %v4981_v12  ;;  %v130_v51 = vld [vmem:[%s5817_s4 + $0x78] sm:$0xff]  ;;  %v5216_v52 = vpack.c.bf16 %v110_v49, %v109_v48  ;;  %v116_v55 = vld [vmem:[%s5817_s4 + $0x8] sm:$0xff]  ;;  %v135_v56 = vld [vmem:[%s5818_s5 + $0x20] sm:$0xff] }
   0xc   :  { %v5218_v53 = vpack.c.bf16 %v130_v51, %v129_v50  ;;  %v136_v57 = vld [vmem:[%s5818_s5 + $0x28] sm:$0xff]  ;;  %v5240_v58 = vpack.c.bf16 %v116_v55, %v115_v54  ;;  %v117_v60 = vld [vmem:[%s5817_s4 + $0x10] sm:$0xff]  ;;  %v118_v61 = vld [vmem:[%s5817_s4 + $0x18] sm:$0xff] }
   0xd   :  { %v5242_v59 = vpack.c.bf16 %v136_v57, %v135_v56  ;;  %v137_v62 = vld [vmem:[%s5818_s5 + $0x30] sm:$0xff]  ;;  %v138_v63 = vld [vmem:[%s5818_s5 + $0x38] sm:$0xff]  ;;  %v131_v18 = vld [vmem:[%s5818_s5] sm:$0xff] }
   0xe   :  { %v5266_v1 = vpack.c.bf16 %v138_v63, %v137_v62  ;;  %v125_v8 = vld [vmem:[%s5817_s4 + $0x50] sm:$0xff]  ;;  %v126_v9 = vld [vmem:[%s5817_s4 + $0x58] sm:$0xff]  ;;  %v140_v28 = vld [vmem:[%s5818_s5 + $0x48] sm:$0xff] }
   0xf   :  { %v145_v11 = vld [vmem:[%s5818_s5 + $0x70] sm:$0xff]  ;;  %v146_v14 = vld [vmem:[%s5818_s5 + $0x78] sm:$0xff]  ;;  %v5312_v15 = vpack.c.bf16 %v126_v9, %v125_v8  ;;  %v151_v8 = vlaneseq }
  0x10   :  { %v5314_v16 = vpack.c.bf16 %v146_v14, %v145_v11  ;;  %v141_v30 = vld [vmem:[%s5818_s5 + $0x50] sm:$0xff] }
  0x11   :  { %v152_v11 = vshrl.u32 %v151_v8, 7  ;;  %v154_v14 = vand.u32 127, %v151_v8 }
  0x13   :  { %vm155_vm3 = vcmp.le.s32.totalorder %v154_v14, %v152_v11 }
  0x90   :  { %v58_v2 = vpop.xlane.xlu0 %57 }
  0x91   :  { %v63_v3 = vmul.f32 0.03125, %v58_v2  ;;  %v123_v2 = vld [vmem:[%s5817_s4 + $0x40] sm:$0xff] }
  0x93   :  { %v65_v4 = vsub.f32 %v51_v0, %v63_v3  ;;  %v5264_v0 = vpack.c.bf16 %v118_v61, %v117_v60  ;;  %v124_v3 = vld [vmem:[%s5817_s4 + $0x48] sm:$0xff] }
  0x95   :  { %v67_v5 = vmul.f32 %v65_v4, %v65_v4 }
  0x97   :  { %v69_v6 = vsel %vm55_vm0, %v67_v5, 0.0  ;;  %v144_v5 = vld [vmem:[%s5818_s5 + $0x68] sm:$0xff] }
  0x98   :  { %70 = vadd.xlane.f32.xlu0 %v69_v6  ;;  %v5288_v6 = vpack.c.bf16 %v124_v3, %v123_v2 }
 0x125   :  { %v71_v21 = vpop.xlane.xlu0 %70 }
 0x126   :  { %v75_v22 = vmul.f32 0.03125, %v71_v21  ;;  %v132_v21 = vld [vmem:[%s5818_s5 + $0x8] sm:$0xff] }
 0x128   :  { %v77_v23 = vadd.f32 1e-05, %v75_v22  ;;  %v5330_v22 = vpack.c.bf16 %v132_v21, %v131_v18  ;;  %v4984_v21 = vmov -1e+30  }
 0x12a   :  { %4892 = vrsqrt.f32 %v77_v23  ;;  %v133_v23 = vld [vmem:[%s5818_s5 + $0x10] sm:$0xff] }
 0x134   :  { %v4893_v24 = vpop.eup %4892 }
 0x135   :  { %v81_v27 = vmul.f32 %v4893_v24, %v65_v4  ;;  %v143_v4 = vld [vmem:[%s5818_s5 + $0x60] sm:$0xff]  ;;  %v134_v24 = vld [vmem:[%s5818_s5 + $0x18] sm:$0xff] }
 0x136   :  { %v5290_v7 = vpack.c.bf16 %v144_v5, %v143_v4  ;;  %v5345_v26 = vpack.c.bf16 %v134_v24, %v133_v23  ;;  %v5408_v23 = vsel %vm155_vm3, 0.0, %v4984_v21 }
 0x137   :  { %v89_v32 = vmul.f32 %v5123_v25, %v81_v27  ;;  %v139_v27 = vld [vmem:[%s5818_s5 + $0x40] sm:$0xff] }
 0x138   :  { %v5359_v29 = vpack.c.bf16 %v140_v28, %v139_v27 }
 0x139   :  { %v5151_v36 = vadd.f32 %v5140_v31, %v89_v32  ;;  %v142_v32 = vld [vmem:[%s5818_s5 + $0x58] sm:$0xff] }
 0x13a   :  { %v5371_v35 = vpack.c.bf16 %v142_v32, %v141_v30 }
 0x13b   :  { %4279 = vmatmul.mubr.msk.f32.vlgmr.msra.gmra.mrb[0].mxu0 %vm55_vm0, %v5151_v36  ;;  %4312 = vmatmul.mubr.msk.f32.vlgmr.msra.gmra.mrb[0].mxu1 %vm55_vm0, %v5151_v36 }
 0x13c   :  { %4708 = vmatpush3.bf16.msra.mxu0 %v5143_v33  ;;  %4732 = vmatpush3.bf16.msra.mxu1 %v5145_v34 }
 0x13d   :  { %4709 = vmatprep.subr.bf16.mxu0 %v4981_v12  ;;  %4733 = vmatprep.subr.bf16.mxu1 %v4981_v12 }
 0x13e   :  { %4289 = vmatprep.mubr.msk.f32.mxu0 %vm4982_vm1, %v4983_v20  ;;  %4333 = vmatprep.mubr.msk.f32.mxu1 %vm4982_vm1, %v4983_v20 }
 0x140   :  { %4711 = vmatpush3.bf16.msra.mxu0 %v5168_v40  ;;  %4735 = vmatpush3.bf16.msra.mxu1 %v5170_v41 }
 0x141   :  { %4712 = vmatprep.subr.bf16.mxu0 %v4981_v12  ;;  %4742 = vmatprep.subr.bf16.mxu1 %v4981_v12 }
 0x143   :  { %4290 = vmatmul.mubr.msk.f32.vlgmr.msra.gmra.mrb[2].mxu0 %vm55_vm0, %v5151_v36  ;;  %4334 = vmatmul.mubr.msk.f32.vlgmr.msra.gmra.mrb[2].mxu1 %vm55_vm0, %v5151_v36 }
 0x144   :  { %4714 = vmatpush3.bf16.msra.mxu0 %v5192_v46  ;;  %4744 = vmatpush3.bf16.msra.mxu1 %v5194_v47 }
 0x145   :  { %4715 = vmatprep.subr.bf16.mxu0 %v4981_v12  ;;  %4745 = vmatprep.subr.bf16.mxu1 %v4981_v12 }
 0x146   :  { %4300 = vmatprep.mubr.msk.f32.mxu0 %vm4982_vm1, %v4983_v20  ;;  %4355 = vmatprep.mubr.msk.f32.mxu1 %vm4982_vm1, %v4983_v20 }
 0x148   :  { %4717 = vmatpush3.bf16.msra.mxu0 %v5216_v52  ;;  %4747 = vmatpush3.bf16.msra.mxu1 %v5218_v53 }
 0x149   :  { %4724 = vmatprep.subr.bf16.mxu0 %v4981_v12  ;;  %4754 = vmatprep.subr.bf16.mxu1 %v4981_v12 }
 0x14b   :  { %4301 = vmatmul.mubr.msk.f32.vlgmr.msra.gmra.mrb[4].mxu0 %vm55_vm0, %v5151_v36  ;;  %4356 = vmatmul.mubr.msk.f32.vlgmr.msra.gmra.mrb[4].mxu1 %vm55_vm0, %v5151_v36 }
 0x14c   :  { %4726 = vmatpush3.bf16.msra.mxu0 %v5240_v58  ;;  %4756 = vmatpush3.bf16.msra.mxu1 %v5242_v59 }
 0x14d   :  { %4727 = vmatprep.subr.bf16.mxu0 %v4981_v12  ;;  %4757 = vmatprep.subr.bf16.mxu1 %v4981_v12 }
 0x14e   :  { %4322 = vmatprep.mubr.msk.f32.mxu0 %vm4982_vm1, %v4983_v20  ;;  %4377 = vmatprep.mubr.msk.f32.mxu1 %vm4982_vm1, %v4983_v20 }
 0x150   :  { %4729 = vmatpush3.bf16.msra.mxu0 %v5264_v0  ;;  %4759 = vmatpush3.bf16.msra.mxu1 %v5266_v1 }
 0x151   :  { %4736 = vmatprep.subr.bf16.mxu0 %v4981_v12  ;;  %4766 = vmatprep.subr.bf16.mxu1 %v4981_v12 }
 0x153   :  { %4323 = vmatmul.mubr.msk.f32.vlgmr.msra.gmra.mrb[6].mxu0 %vm55_vm0, %v5151_v36  ;;  %4378 = vmatmul.mubr.msk.f32.vlgmr.msra.gmra.mrb[6].mxu1 %vm55_vm0, %v5151_v36 }
 0x154   :  { %4738 = vmatpush3.bf16.msra.mxu0 %v5288_v6  ;;  %4768 = vmatpush3.bf16.msra.mxu1 %v5290_v7 }
 0x155   :  { %4739 = vmatprep.subr.bf16.mxu0 %v4981_v12  ;;  %4769 = vmatprep.subr.bf16.mxu1 %v4981_v12 }
 0x156   :  { %4344 = vmatprep.mubr.msk.f32.mxu0 %vm4982_vm1, %v4983_v20  ;;  %4399 = vmatprep.mubr.msk.f32.mxu1 %vm4982_vm1, %v4983_v20 }
 0x158   :  { %4741 = vmatpush3.bf16.msra.mxu0 %v5312_v15  ;;  %4771 = vmatpush3.bf16.msra.mxu1 %v5314_v16 }
 0x159   :  { %4748 = vmatprep.subr.bf16.mxu0 %v4981_v12  ;;  %4417 = vmatprep.subr.mxu1 %v4983_v20 }
 0x15b   :  { %4345 = vmatmul.mubr.msk.f32.vlgmr.msra.gmra.mrb[8].mxu0 %vm55_vm0, %v5151_v36  ;;  %4400 = vmatmul.mubr.msk.f32.vlgmr.msra.gmra.mrb[8].mxu1 %vm55_vm0, %v5151_v36 }
 0x15c   :  { %4750 = vmatpush3.bf16.msra.mxu0 %v5330_v22  ;;  %4366 = vmatprep.mubr.msk.f32.mxu0 %vm4982_vm1, %v4983_v20 }
 0x15d   :  { %4751 = vmatprep.subr.bf16.mxu0 %v4981_v12  ;;  %4419 = vmatprep.mubr.msk.f32.mxu1 %vm4982_vm1, %v4983_v20 }
 0x160   :  { %4753 = vmatpush3.bf16.msra.mxu0 %v5345_v26 }
 0x161   :  { %4760 = vmatprep.subr.bf16.mxu0 %v4981_v12 }
 0x163   :  { %4367 = vmatmul.mubr.msk.f32.vlgmr.msra.gmra.mrb[10].mxu0 %vm55_vm0, %v5151_v36 }
 0x164   :  { %4762 = vmatpush3.bf16.msra.mxu0 %v5359_v29  ;;  %4388 = vmatprep.mubr.msk.f32.mxu0 %vm4982_vm1, %v4983_v20 }
 0x165   :  { %4763 = vmatprep.subr.bf16.mxu0 %v4981_v12 }
 0x168   :  { %4765 = vmatpush3.bf16.msra.mxu0 %v5371_v35 }
 0x169   :  { %4402 = vmatprep.subr.mxu0 %v4983_v20 }
 0x16b   :  { %4389 = vmatmul.mubr.msk.f32.vlgmr.msra.gmra.mrb[12].mxu0 %vm55_vm0, %v5151_v36 }
 0x16c   :  { %4404 = vmatprep.mubr.msk.f32.mxu0 %vm4982_vm1, %v4983_v20 }
 0x20e   :  { %v226_v37 = vpop.f32.mrb[0].mxu0  ;;  %v436_v38 = vpop.f32.mrb[0].mxu1 }
 0x20f   :  { %v4280_v39 = vpop.f32.mrb[1].mxu0  ;;  %v4313_v42 = vpop.f32.mrb[1].mxu1 }
 0x216   :  { %v296_v43 = vpop.f32.mrb[2].mxu0  ;;  %v576_v44 = vpop.f32.mrb[2].mxu1 }
 0x217   :  { %v4291_v45 = vpop.f32.mrb[3].mxu0  ;;  %v4335_v48 = vpop.f32.mrb[3].mxu1 }
 0x21e   :  { %v366_v49 = vpop.f32.mrb[4].mxu0  ;;  %v716_v50 = vpop.f32.mrb[4].mxu1 }
 0x21f   :  { %v4302_v51 = vpop.f32.mrb[5].mxu0  ;;  %v4357_v54 = vpop.f32.mrb[5].mxu1  ;;  %4418 = vmatpush3.xpose.msk.msra.mxu1 %vm1000_vm2, %v716_v50 }
 0x220   :  { %4427 = vmatprep.subr.mxu1 %v4983_v20 }
 0x222   :  { %4420 = vmatmul.mubr.msk.f32.vlgmr.msra.gmra.mrb[10].mxu1 %vm1000_vm2, %v436_v38 }
 0x223   :  { %4429 = vmatprep.mubr.msk.f32.mxu1 %vm4982_vm1, %v4983_v20 }
 0x226   :  { %v506_v36 = vpop.f32.mrb[6].mxu0  ;;  %v856_v55 = vpop.f32.mrb[6].mxu1 }
 0x227   :  { %v4324_v56 = vpop.f32.mrb[7].mxu0  ;;  %v4379_v57 = vpop.f32.mrb[7].mxu1  ;;  %4403 = vmatpush3.xpose.msk.msra.mxu0 %vm1000_vm2, %v506_v36  ;;  %4428 = vmatpush3.msra.mxu1 %v856_v55 }
 0x228   :  { %4407 = vmatprep.subr.mxu0 %v4983_v20  ;;  %4437 = vmatprep.subr.mxu1 %v4983_v20 }
 0x22a   :  { %4405 = vmatmul.mubr.msk.f32.vlgmr.msra.gmra.mrb[14].mxu0 %vm1000_vm2, %v226_v37 }
 0x22b   :  { %4408 = vmatpush3.xpose.msk.msra.mxu0 %vm1000_vm2, %v576_v44  ;;  %4409 = vmatprep.mubr.msk.f32.mxu0 %vm4982_vm1, %v4983_v20 }
 0x22c   :  { %4412 = vmatprep.subr.mxu0 %v4983_v20 }
 0x22e   :  { %v646_v60 = vpop.f32.mrb[8].mxu0  ;;  %v5395_v61 = vpop.f32.mrb[8].mxu1  ;;  %4410 = vmatmul.mubr.msk.f32.vlgmr.msra.gmra.mrb[16].mxu0 %vm1000_vm2, %v296_v43 }
 0x22f   :  { %v4346_v62 = vpop.f32.mrb[9].mxu0  ;;  %v4401_v63 = vpop.f32.mrb[9].mxu1  ;;  %4413 = vmatpush3.xpose.msk.msra.mxu0 %vm1000_vm2, %v646_v60  ;;  %4414 = vmatprep.mubr.msk.f32.mxu0 %vm4982_vm1, %v4983_v20 }
 0x230   :  { %4422 = vmatprep.subr.mxu0 %v4983_v20 }
 0x232   :  { %4415 = vmatmul.mubr.msk.f32.vlgmr.msra.gmra.mrb[18].mxu0 %vm1000_vm2, %v366_v49 }
 0x233   :  { %4424 = vmatprep.mubr.msk.f32.mxu0 %vm4982_vm1, %v4983_v20 }
 0x236   :  { %v786_v2 = vpop.f32.mrb[10].mxu0 }
 0x237   :  { %v4368_v3 = vpop.f32.mrb[11].mxu0  ;;  %4423 = vmatpush3.msra.mxu0 %v786_v2 }
 0x238   :  { %4432 = vmatprep.subr.mxu0 %v4983_v20 }
 0x23e   :  { %v5406_v4 = vpop.f32.mrb[12].mxu0 }
 0x23f   :  { %v4390_v5 = vpop.f32.mrb[13].mxu0 }
 0x2f5   :  { %v1301_v9 = vpop.f32.mrb[10].mxu1 }
 0x2f6   :  { %v4421_v18 = vpop.f32.mrb[11].mxu1  ;;  %v1302_v39 = vadd.f32 %v1301_v9, %v5408_v23 }
 0x2f8   :  { %v1314_v48 = vsel %vm1000_vm2, %v1302_v39, -inf }
 0x2fd   :  { %v1073_v24 = vpop.f32.mrb[14].mxu0 }
 0x2fe   :  { %v1074_v27 = vadd.f32 %v1073_v24, %v5408_v23  ;;  %v4406_v28 = vpop.f32.mrb[15].mxu0  ;;  %v5424_v24 = vld [vmem:[%s5813_s0 + $0x8] sm:$0xff] }
 0x2ff   :  { %v59_v28 = vsel %vm55_vm0, %v5424_v24, 0.0 }
 0x300   :  { %v1305_v30 = vsel %vm1000_vm2, %v1074_v27, -inf }
 0x301   :  { %1306 = vmax.xlane.f32.xlu1 %v1305_v30  ;;  %v1149_v32 = vpop.f32.mrb[16].mxu0 }
 0x302   :  { %v1150_v37 = vadd.f32 %v1149_v32, %v5408_v23  ;;  %v4411_v38 = vpop.f32.mrb[17].mxu0 }
 0x304   :  { %v1308_v42 = vsel %vm1000_vm2, %v1150_v37, -inf }
 0x305   :  { %1309 = vmax.xlane.f32.xlu1 %v1308_v42  ;;  %v1225_v43 = vpop.f32.mrb[18].mxu0 }
 0x306   :  { %v1226_v44 = vadd.f32 %v1225_v43, %v5408_v23  ;;  %v4416_v45 = vpop.f32.mrb[19].mxu0 }
 0x308   :  { %v1311_v49 = vsel %vm1000_vm2, %v1226_v44, -inf }
 0x309   :  { %1315 = vmax.xlane.f32.xlu1 %v1314_v48  ;;  %1312 = vmax.xlane.f32.xlu0 %v1311_v49 }
 0x38e   :  { %v1307_v50 = vpop.xlane.xlu1 %1306 }
 0x38f   :  { %v1317_v51 = vsub.f32 %v1074_v27, %v1307_v50 }
 0x391   :  { %v1321_v54 = vmul.f32 1.442695, %v1317_v51 }
 0x392   :  { %v1310_v36 = vpop.xlane.xlu1 %1309 }
 0x393   :  { %4894 = vpow2.f32 %v1321_v54  ;;  %v1318_v55 = vsub.f32 %v1150_v37, %v1310_v36 }
 0x395   :  { %v1323_v56 = vmul.f32 1.442695, %v1318_v55 }
 0x396   :  { %v1316_v57 = vpop.xlane.xlu1 %1315  ;;  %v1313_v60 = vpop.xlane.xlu0 %1312 }
 0x397   :  { %4896 = vpow2.f32 %v1323_v56  ;;  %v1320_v62 = vsub.f32 %v1302_v39, %v1316_v57  ;;  %v1319_v63 = vsub.f32 %v1226_v44, %v1313_v60  ;;  %v5461_v56 = vld [vmem:[%s5819_s6 + $0x8] sm:$0xff] }
 0x399   :  { %v1327_v2 = vmul.f32 1.442695, %v1320_v62  ;;  %v1325_v3 = vmul.f32 1.442695, %v1319_v63  ;;  %v5468_v63 = vld [vmem:[%s5819_s6 + $0x10] sm:$0xff] }
 0x39b   :  { %4898 = vpow2.f32 %v1327_v2 }
 0x39c   :  { %4900 = vpow2.f32 %v1325_v3 }
 0x39d   :  { %v4895_v5 = vpop.eup %4894 }
 0x39e   :  { %v1329_v8 = vsel %vm1000_vm2, %v4895_v5, 0.0 }
 0x39f   :  { %1330 = vadd.xlane.f32.xlu0 %v1329_v8 }
 0x3a1   :  { %v4897_v9 = vpop.eup %4896 }
 0x3a2   :  { %v1332_v11 = vsel %vm1000_vm2, %v4897_v9, 0.0 }
 0x3a3   :  { %1333 = vadd.xlane.f32.xlu1 %v1332_v11 }
 0x3a5   :  { %v4899_v14 = vpop.eup %4898 }
 0x3a6   :  { %v4901_v18 = vpop.eup %4900  ;;  %v1338_v21 = vsel %vm1000_vm2, %v4899_v14, 0.0 }
 0x3a7   :  { %1339 = vadd.xlane.f32.xlu1 %v1338_v21  ;;  %v1335_v27 = vsel %vm1000_vm2, %v4901_v18, 0.0 }
 0x3a8   :  { %1336 = vadd.xlane.f32.xlu0 %v1335_v27 }
 0x3ac   :  { %60 = vadd.xlane.f32.xlu0 %v59_v28 }
 0x42c   :  { %v1331_v30 = vpop.xlane.xlu0 %1330 }
 0x42d   :  { %4902 = vrcp.f32 %v1331_v30 }
 0x430   :  { %v1334_v32 = vpop.xlane.xlu1 %1333 }
 0x431   :  { %4904 = vrcp.f32 %v1334_v32 }
 0x434   :  { %v1340_v37 = vpop.xlane.xlu1 %1339 }
 0x435   :  { %4906 = vrcp.f32 %v1340_v37  ;;  %v1337_v38 = vpop.xlane.xlu0 %1336 }
 0x436   :  { %4908 = vrcp.f32 %v1337_v38 }
 0x437   :  { %v4903_v39 = vpop.eup %4902 }
 0x438   :  { %v1345_v42 = vmul.f32 %v4903_v39, %v4895_v5  ;;  %v5477_v5 = vld [vmem:[%s5819_s6 + $0x18] sm:$0xff] }
 0x439   :  { %v61_v43 = vpop.xlane.xlu0 %60 }
 0x43a   :  { %3722 = vst.msk [vmem:[#allocation4] sm:$0xff] %vm1000_vm2, %v1345_v42  ;;  %v64_v44 = vmul.f32 0.03125, %v61_v43  ;;  %4425 = vmatmul.mubr.msk.f32.vlgmr.msra.gmra.mrb[20].mxu0 %vm1000_vm2, %v1345_v42 }
 0x43b   :  { %v4905_v45 = vpop.eup %4904  ;;  %4433 = vmatpush3.msra.mxu0 %v5406_v4  ;;  %4434 = vmatprep.mubr.msk.f32.mxu0 %vm4982_vm1, %v4983_v20 }
 0x43c   :  { %v1346_v48 = vmul.f32 %v4905_v45, %v4897_v9  ;;  %v66_v49 = vsub.f32 %v5424_v24, %v64_v44  ;;  %4442 = vmatprep.subr.mxu0 %v4983_v20 }
 0x43e   :  { %3723 = vst.msk [vmem:[#allocation4 + $0x8] sm:$0xff] %vm1000_vm2, %v1346_v48  ;;  %4430 = vmatmul.mubr.msk.f32.vlgmr.msra.gmra.mrb[12].mxu1 %vm1000_vm2, %v1346_v48  ;;  %v68_v50 = vmul.f32 %v66_v49, %v66_v49 }
 0x43f   :  { %v4907_v51 = vpop.eup %4906  ;;  %4438 = vmatpush3.msra.mxu1 %v5395_v61  ;;  %4439 = vmatprep.mubr.msk.f32.mxu1 %vm4982_vm1, %v4983_v20  ;;  %v5454_v61 = vld [vmem:[%s5819_s6] sm:$0xff] }
 0x440   :  { %v4909_v4 = vpop.eup %4908  ;;  %v1348_v54 = vmul.f32 %v4907_v51, %v4899_v14  ;;  %v72_v36 = vsel %vm55_vm0, %v68_v50, 0.0  ;;  %4447 = vmatprep.subr.mxu1 %v4983_v20 }
 0x441   :  { %v1347_v55 = vmul.f32 %v4909_v4, %v4901_v18  ;;  %73 = vadd.xlane.f32.xlu1 %v72_v36 }
 0x442   :  { %3725 = vst.msk [vmem:[#allocation4 + $0x18] sm:$0xff] %vm1000_vm2, %v1348_v54  ;;  %4440 = vmatmul.mubr.msk.f32.vlgmr.msra.gmra.mrb[14].mxu1 %vm1000_vm2, %v1348_v54 }
 0x443   :  { %3724 = vst.msk [vmem:[#allocation4 + $0x10] sm:$0xff] %vm1000_vm2, %v1347_v55  ;;  %4435 = vmatmul.mubr.msk.f32.vlgmr.msra.gmra.mrb[22].mxu0 %vm1000_vm2, %v1347_v55  ;;  %4449 = vmatprep.mubr.msk.f32.mxu1 %vm4982_vm1, %v4983_v20 }
 0x444   :  { %4444 = vmatprep.mubr.msk.f32.mxu0 %vm4982_vm1, %v4983_v20  ;;  %4443 = vmatpush3.msra.mxu0 %v5454_v61 }
 0x445   :  { %4452 = vmatprep.subr.mxu0 %v4983_v20  ;;  %4448 = vmatpush3.msra.mxu1 %v5461_v56 }
 0x446   :  { %4457 = vmatprep.subr.mxu1 %v4983_v20 }
 0x4ce   :  { %v74_v57 = vpop.xlane.xlu1 %73 }
 0x4cf   :  { %v76_v60 = vmul.f32 0.03125, %v74_v57 }
 0x4d1   :  { %v78_v62 = vadd.f32 1e-05, %v76_v60 }
 0x4d3   :  { %4910 = vrsqrt.f32 %v78_v62 }
 0x4dd   :  { %v4911_v8 = vpop.eup %4910 }
 0x4de   :  { %v82_v14 = vmul.f32 %v4911_v8, %v66_v49 }
 0x4e0   :  { %v90_v30 = vmul.f32 %v5123_v25, %v82_v14 }
 0x4e2   :  { %v5498_v32 = vadd.f32 %v5140_v31, %v90_v30 }
 0x50d   :  { %v1418_v2 = vpop.f32.mrb[20].mxu0 }
 0x50e   :  { %v4426_v3 = vpop.f32.mrb[21].mxu0  ;;  %4445 = vmatmul.mubr.msk.f32.vlgmr.msra.gmra.mrb[24].mxu0 %vm1000_vm2, %v1418_v2 }
 0x50f   :  { %4453 = vmatpush3.msra.mxu0 %v5468_v63  ;;  %4454 = vmatprep.mubr.msk.f32.mxu0 %vm4982_vm1, %v4983_v20 }
 0x510   :  { %4772 = vmatprep.subr.bf16.mxu0 %v4981_v12 }
 0x511   :  { %v1491_v9 = vpop.f32.mrb[12].mxu1 }
 0x512   :  { %v4431_v11 = vpop.f32.mrb[13].mxu1  ;;  %4450 = vmatmul.mubr.msk.f32.vlgmr.msra.gmra.mrb[16].mxu1 %vm1000_vm2, %v1491_v9 }
 0x513   :  { %4458 = vmatpush3.msra.mxu1 %v5477_v5  ;;  %4459 = vmatprep.mubr.msk.f32.mxu1 %vm4982_vm1, %v4983_v20 }
 0x514   :  { %4778 = vmatprep.subr.bf16.mxu1 %v4981_v12 }
 0x515   :  { %v1637_v18 = vpop.f32.mrb[14].mxu1 }
 0x516   :  { %v1564_v21 = vpop.f32.mrb[22].mxu0  ;;  %v4441_v27 = vpop.f32.mrb[15].mxu1  ;;  %4460 = vmatmul.mubr.msk.f32.vlgmr.msra.gmra.mrb[18].mxu1 %vm1000_vm2, %v1637_v18 }
 0x517   :  { %v4436_v28 = vpop.f32.mrb[23].mxu0  ;;  %4455 = vmatmul.mubr.msk.f32.vlgmr.msra.gmra.mrb[26].mxu0 %vm1000_vm2, %v1564_v21  ;;  %4780 = vmatpush3.bf16.msra.mxu1 %v5143_v33 }
 0x518   :  { %4774 = vmatpush3.bf16.msra.mxu0 %v5083_v10  ;;  %4781 = vmatprep.subr.bf16.mxu1 %v4981_v12 }
 0x519   :  { %4775 = vmatprep.subr.bf16.mxu0 %v4981_v12  ;;  %4470 = vmatprep.mubr.msk.f32.mxu0 %vm4982_vm1, %v4983_v20 }
 0x51a   :  { %4481 = vmatprep.mubr.msk.f32.mxu1 %vm4982_vm1, %v4983_v20 }
 0x51b   :  { %4783 = vmatpush3.bf16.msra.mxu1 %v5168_v40 }
 0x51c   :  { %4777 = vmatpush3.bf16.msra.mxu0 %v5105_v17  ;;  %4790 = vmatprep.subr.bf16.mxu1 %v4981_v12 }
 0x51d   :  { %4784 = vmatprep.subr.bf16.mxu0 %v4981_v12 }
 0x51e   :  { %4482 = vmatmul.mubr.msk.f32.vlgmr.msra.gmra.mrb[20].mxu1 %vm55_vm0, %v5498_v32 }
 0x51f   :  { %4471 = vmatmul.mubr.msk.f32.vlgmr.msra.gmra.mrb[28].mxu0 %vm55_vm0, %v5498_v32  ;;  %4792 = vmatpush3.bf16.msra.mxu1 %v5090_v13 }
 0x520   :  { %4786 = vmatpush3.bf16.msra.mxu0 %v5192_v46  ;;  %4793 = vmatprep.subr.bf16.mxu1 %v4981_v12 }
 0x521   :  { %4787 = vmatprep.subr.bf16.mxu0 %v4981_v12  ;;  %4492 = vmatprep.mubr.msk.f32.mxu0 %vm4982_vm1, %v4983_v20 }
 0x522   :  { %4503 = vmatprep.mubr.msk.f32.mxu1 %vm4982_vm1, %v4983_v20 }
 0x523   :  { %4795 = vmatpush3.bf16.msra.mxu1 %v5110_v19 }
 0x524   :  { %4789 = vmatpush3.bf16.msra.mxu0 %v5216_v52  ;;  %4802 = vmatprep.subr.bf16.mxu1 %v4981_v12 }
 0x525   :  { %4796 = vmatprep.subr.bf16.mxu0 %v4981_v12 }
 0x526   :  { %4504 = vmatmul.mubr.msk.f32.vlgmr.msra.gmra.mrb[22].mxu1 %vm55_vm0, %v5498_v32 }
 0x527   :  { %4493 = vmatmul.mubr.msk.f32.vlgmr.msra.gmra.mrb[30].mxu0 %vm55_vm0, %v5498_v32  ;;  %4804 = vmatpush3.bf16.msra.mxu1 %v5145_v34 }
 0x528   :  { %4798 = vmatpush3.bf16.msra.mxu0 %v5240_v58  ;;  %4805 = vmatprep.subr.bf16.mxu1 %v4981_v12 }
 0x529   :  { %4799 = vmatprep.subr.bf16.mxu0 %v4981_v12  ;;  %4514 = vmatprep.mubr.msk.f32.mxu0 %vm4982_vm1, %v4983_v20 }
 0x52a   :  { %4525 = vmatprep.mubr.msk.f32.mxu1 %vm4982_vm1, %v4983_v20 }
 0x52b   :  { %4807 = vmatpush3.bf16.msra.mxu1 %v5170_v41 }
 0x52c   :  { %4801 = vmatpush3.bf16.msra.mxu0 %v5264_v0  ;;  %4814 = vmatprep.subr.bf16.mxu1 %v4981_v12 }
 0x52d   :  { %4808 = vmatprep.subr.bf16.mxu0 %v4981_v12 }
 0x52e   :  { %4526 = vmatmul.mubr.msk.f32.vlgmr.msra.gmra.mrb[24].mxu1 %vm55_vm0, %v5498_v32 }
 0x52f   :  { %4515 = vmatmul.mubr.msk.f32.vlgmr.msra.gmra.mrb[32].mxu0 %vm55_vm0, %v5498_v32  ;;  %4816 = vmatpush3.bf16.msra.mxu1 %v5194_v47 }
 0x530   :  { %4810 = vmatpush3.bf16.msra.mxu0 %v5288_v6  ;;  %4817 = vmatprep.subr.bf16.mxu1 %v4981_v12 }
 0x531   :  { %4811 = vmatprep.subr.bf16.mxu0 %v4981_v12  ;;  %4536 = vmatprep.mubr.msk.f32.mxu0 %vm4982_vm1, %v4983_v20 }
 0x532   :  { %4547 = vmatprep.mubr.msk.f32.mxu1 %vm4982_vm1, %v4983_v20 }
 0x533   :  { %4819 = vmatpush3.bf16.msra.mxu1 %v5218_v53 }
 0x534   :  { %4813 = vmatpush3.bf16.msra.mxu0 %v5312_v15  ;;  %4826 = vmatprep.subr.bf16.mxu1 %v4981_v12 }
 0x535   :  { %4820 = vmatprep.subr.bf16.mxu0 %v4981_v12 }
 0x536   :  { %4548 = vmatmul.mubr.msk.f32.vlgmr.msra.gmra.mrb[26].mxu1 %vm55_vm0, %v5498_v32 }
 0x537   :  { %4537 = vmatmul.mubr.msk.f32.vlgmr.msra.gmra.mrb[34].mxu0 %vm55_vm0, %v5498_v32  ;;  %4828 = vmatpush3.bf16.msra.mxu1 %v5242_v59 }
 0x538   :  { %4822 = vmatpush3.bf16.msra.mxu0 %v5330_v22  ;;  %4829 = vmatprep.subr.bf16.mxu1 %v4981_v12 }
 0x539   :  { %4823 = vmatprep.subr.bf16.mxu0 %v4981_v12  ;;  %4558 = vmatprep.mubr.msk.f32.mxu0 %vm4982_vm1, %v4983_v20 }
 0x53a   :  { %4569 = vmatprep.mubr.msk.f32.mxu1 %vm4982_vm1, %v4983_v20 }
 0x53b   :  { %4831 = vmatpush3.bf16.msra.mxu1 %v5266_v1 }
 0x53c   :  { %4825 = vmatpush3.bf16.msra.mxu0 %v5345_v26  ;;  %4838 = vmatprep.subr.bf16.mxu1 %v4981_v12 }
 0x53d   :  { %4832 = vmatprep.subr.bf16.mxu0 %v4981_v12 }
 0x53e   :  { %4570 = vmatmul.mubr.msk.f32.vlgmr.msra.gmra.mrb[28].mxu1 %vm55_vm0, %v5498_v32 }
 0x53f   :  { %4559 = vmatmul.mubr.msk.f32.vlgmr.msra.gmra.mrb[36].mxu0 %vm55_vm0, %v5498_v32  ;;  %4840 = vmatpush3.bf16.msra.mxu1 %v5290_v7 }
 0x540   :  { %4834 = vmatpush3.bf16.msra.mxu0 %v5359_v29  ;;  %4841 = vmatprep.subr.bf16.mxu1 %v4981_v12 }
 0x541   :  { %4835 = vmatprep.subr.bf16.mxu0 %v4981_v12  ;;  %4580 = vmatprep.mubr.msk.f32.mxu0 %vm4982_vm1, %v4983_v20 }
 0x542   :  { %4591 = vmatprep.mubr.msk.f32.mxu1 %vm4982_vm1, %v4983_v20 }
 0x543   :  { %4843 = vmatpush3.bf16.msra.mxu1 %v5314_v16 }
 0x544   :  { %4837 = vmatpush3.bf16.msra.mxu0 %v5371_v35  ;;  %4599 = vmatprep.subr.mxu1 %v4983_v20 }
 0x545   :  { %4594 = vmatprep.subr.mxu0 %v4983_v20 }
 0x546   :  { %4592 = vmatmul.mubr.msk.f32.vlgmr.msra.gmra.mrb[30].mxu1 %vm55_vm0, %v5498_v32 }
 0x547   :  { %4581 = vmatmul.mubr.msk.f32.vlgmr.msra.gmra.mrb[38].mxu0 %vm55_vm0, %v5498_v32  ;;  %4601 = vmatprep.mubr.msk.f32.mxu1 %vm4982_vm1, %v4983_v20 }
 0x548   :  { %4596 = vmatprep.mubr.msk.f32.mxu0 %vm4982_vm1, %v4983_v20 }
 0x5e1   :  { %v1710_v10 = vpop.f32.mrb[24].mxu0 }
 0x5e2   :  { %v4446_v12 = vpop.f32.mrb[25].mxu0  ;;  %v1933_v17 = vsel %vm55_vm0, %v1710_v10, 0.0 }
 0x5e5   :  { %v1783_v13 = vpop.f32.mrb[16].mxu1 }
 0x5e6   :  { %v1934_v19 = vsel %vm55_vm0, %v1783_v13, 0.0  ;;  %v4451_v25 = vpop.f32.mrb[17].mxu1 }
 0x5e7   :  { %v1935_v31 = vadd.f32 %v1934_v19, %v1933_v17 }
 0x5e9   :  { %v1929_v33 = vpop.f32.mrb[18].mxu1 }
 0x5ea   :  { %v1856_v34 = vpop.f32.mrb[26].mxu0  ;;  %v4461_v40 = vpop.f32.mrb[19].mxu1  ;;  %v1938_v52 = vsel %vm55_vm0, %v1929_v33, 0.0 }
 0x5eb   :  { %v1936_v41 = vsel %vm55_vm0, %v1856_v34, 0.0  ;;  %v4456_v46 = vpop.f32.mrb[27].mxu0 }
 0x5ec   :  { %v1937_v47 = vadd.f32 %v1936_v41, %v1935_v31 }
 0x5ee   :  { %v5595_v53 = vadd.f32 %v1938_v52, %v1937_v47  ;;  %v5636_v52 = vld [vmem:[%s5820_s7] ss:$0 sm:$0xff] }
 0x5f1   :  { %v2079_v58 = vpop.f32.mrb[20].mxu1 }
 0x5f2   :  { %v2009_v59 = vpop.f32.mrb[28].mxu0  ;;  %v4483_v0 = vpop.f32.mrb[21].mxu1 }
 0x5f3   :  { %v4472_v1 = vpop.f32.mrb[29].mxu0 }
 0x5f9   :  { %v2219_v6 = vpop.f32.mrb[22].mxu1 }
 0x5fa   :  { %v2149_v7 = vpop.f32.mrb[30].mxu0  ;;  %v4505_v15 = vpop.f32.mrb[23].mxu1 }
 0x5fb   :  { %v4494_v16 = vpop.f32.mrb[31].mxu0 }
 0x601   :  { %v2359_v22 = vpop.f32.mrb[24].mxu1 }
 0x602   :  { %v2289_v26 = vpop.f32.mrb[32].mxu0  ;;  %v4527_v29 = vpop.f32.mrb[25].mxu1  ;;  %4600 = vmatpush3.xpose.msk.msra.mxu1 %vm1000_vm2, %v2359_v22 }
 0x603   :  { %v4516_v35 = vpop.f32.mrb[33].mxu0  ;;  %4595 = vmatpush3.xpose.msk.msra.mxu0 %vm1000_vm2, %v2289_v26  ;;  %4609 = vmatprep.subr.mxu1 %v4983_v20 }
 0x604   :  { %4604 = vmatprep.subr.mxu0 %v4983_v20 }
 0x605   :  { %4602 = vmatmul.mubr.msk.f32.vlgmr.msra.gmra.mrb[32].mxu1 %vm1000_vm2, %v2079_v58  ;;  %v3737_v58 = vadd.f32 %v5636_v52, %v5595_v53 }
 0x606   :  { %4597 = vmatmul.mubr.msk.f32.vlgmr.msra.gmra.mrb[40].mxu0 %vm1000_vm2, %v2009_v59  ;;  %4611 = vmatprep.mubr.msk.f32.mxu1 %vm4982_vm1, %v4983_v20 }
 0x607   :  { %4606 = vmatprep.mubr.msk.f32.mxu0 %vm4982_vm1, %v4983_v20 }
 0x609   :  { %v2499_v37 = vpop.f32.mrb[26].mxu1 }
 0x60a   :  { %v2429_v38 = vpop.f32.mrb[34].mxu0  ;;  %v4549_v39 = vpop.f32.mrb[27].mxu1  ;;  %4610 = vmatpush3.xpose.msk.msra.mxu1 %vm1000_vm2, %v2499_v37 }
 0x60b   :  { %v4538_v42 = vpop.f32.mrb[35].mxu0  ;;  %4605 = vmatpush3.xpose.msk.msra.mxu0 %vm1000_vm2, %v2429_v38  ;;  %4619 = vmatprep.subr.mxu1 %v4983_v20 }
 0x60c   :  { %4614 = vmatprep.subr.mxu0 %v4983_v20 }
 0x60d   :  { %4612 = vmatmul.mubr.msk.f32.vlgmr.msra.gmra.mrb[34].mxu1 %vm1000_vm2, %v2219_v6 }
 0x60e   :  { %4607 = vmatmul.mubr.msk.f32.vlgmr.msra.gmra.mrb[42].mxu0 %vm1000_vm2, %v2149_v7  ;;  %4621 = vmatprep.mubr.msk.f32.mxu1 %vm4982_vm1, %v4983_v20  ;;  %v4932_v7 = vld [vmem:[%s5813_s0] sm:$0xff] }
 0x60f   :  { %4616 = vmatprep.mubr.msk.f32.mxu0 %vm4982_vm1, %v4983_v20  ;;  %v5645_v15 = vadd.f32 %v4932_v7, %v3737_v58  ;;  %v3788_v7 = vld [vmem:[%s5823_s10 + $0x18] sm:$0xff] }
 0x611   :  { %v2639_v43 = vpop.f32.mrb[28].mxu1  ;;  %v3743_v16 = vsel %vm55_vm0, %v5645_v15, 0.0 }
 0x612   :  { %v2569_v44 = vpop.f32.mrb[36].mxu0  ;;  %v4571_v45 = vpop.f32.mrb[29].mxu1  ;;  %4620 = vmatpush3.msra.mxu1 %v2639_v43 }
 0x613   :  { %v4560_v48 = vpop.f32.mrb[37].mxu0  ;;  %4615 = vmatpush3.msra.mxu0 %v2569_v44  ;;  %4629 = vmatprep.subr.mxu1 %v4983_v20 }
 0x614   :  { %4624 = vmatprep.subr.mxu0 %v4983_v20 }
 0x619   :  { %v5619_v49 = vpop.f32.mrb[30].mxu1 }
 0x61a   :  { %v5621_v50 = vpop.f32.mrb[38].mxu0  ;;  %v4593_v51 = vpop.f32.mrb[31].mxu1 }
 0x61b   :  { %v4582_v4 = vpop.f32.mrb[39].mxu0 }
 0x6d8   :  { %v2931_v54 = vpop.f32.mrb[32].mxu1 }
 0x6d9   :  { %v2855_v36 = vpop.f32.mrb[40].mxu0  ;;  %v2932_v55 = vadd.f32 %v2931_v54, %v5408_v23  ;;  %v4603_v57 = vpop.f32.mrb[33].mxu1 }
 0x6da   :  { %v2856_v60 = vadd.f32 %v2855_v36, %v5408_v23  ;;  %v4598_v62 = vpop.f32.mrb[41].mxu0 }
 0x6db   :  { %v3090_v2 = vsel %vm1000_vm2, %v2932_v55, -inf }
 0x6dc   :  { %3091 = vmax.xlane.f32.xlu1 %v3090_v2  ;;  %v3087_v3 = vsel %vm1000_vm2, %v2856_v60, -inf }
 0x6dd   :  { %3088 = vmax.xlane.f32.xlu0 %v3087_v3  ;;  %v5681_v3 = vld [vmem:[%s5821_s8] ss:$0 sm:$0xff] }
 0x6e0   :  { %v3083_v8 = vpop.f32.mrb[34].mxu1 }
 0x6e1   :  { %v3007_v9 = vpop.f32.mrb[42].mxu0  ;;  %v3084_v11 = vadd.f32 %v3083_v8, %v5408_v23  ;;  %v4613_v14 = vpop.f32.mrb[35].mxu1 }
 0x6e2   :  { %v3008_v18 = vadd.f32 %v3007_v9, %v5408_v23  ;;  %v4608_v21 = vpop.f32.mrb[43].mxu0  ;;  %v5692_v9 = vld [vmem:[%s5822_s9] ss:$0 sm:$0xff] }
 0x6e3   :  { %v3096_v27 = vsel %vm1000_vm2, %v3084_v11, -inf }
 0x6e4   :  { %3097 = vmax.xlane.f32.xlu1 %v3096_v27  ;;  %v3093_v28 = vsel %vm1000_vm2, %v3008_v18, -inf }
 0x6e5   :  { %3094 = vmax.xlane.f32.xlu0 %v3093_v28 }
 0x769   :  { %v3092_v30 = vpop.xlane.xlu1 %3091 }
 0x76a   :  { %v3100_v32 = vsub.f32 %v2932_v55, %v3092_v30  ;;  %v3089_v10 = vpop.xlane.xlu0 %3088 }
 0x76b   :  { %v3099_v12 = vsub.f32 %v2856_v60, %v3089_v10 }
 0x76c   :  { %v3105_v13 = vmul.f32 1.442695, %v3100_v32 }
 0x76d   :  { %v3103_v17 = vmul.f32 1.442695, %v3099_v12 }
 0x76e   :  { %4912 = vpow2.f32 %v3105_v13 }
 0x76f   :  { %4914 = vpow2.f32 %v3103_v17 }
 0x771   :  { %v3098_v19 = vpop.xlane.xlu1 %3097 }
 0x772   :  { %v3102_v25 = vsub.f32 %v3084_v11, %v3098_v19  ;;  %v3095_v31 = vpop.xlane.xlu0 %3094 }
 0x773   :  { %v3101_v33 = vsub.f32 %v3008_v18, %v3095_v31 }
 0x774   :  { %v3109_v23 = vmul.f32 1.442695, %v3102_v25 }
 0x775   :  { %v3107_v34 = vmul.f32 1.442695, %v3101_v33 }
 0x776   :  { %4916 = vpow2.f32 %v3109_v23 }
 0x777   :  { %4918 = vpow2.f32 %v3107_v34 }
 0x778   :  { %v4913_v40 = vpop.eup %4912 }
 0x779   :  { %v4915_v41 = vpop.eup %4914  ;;  %v3114_v46 = vsel %vm1000_vm2, %v4913_v40, 0.0 }
 0x77a   :  { %3115 = vadd.xlane.f32.xlu1 %v3114_v46  ;;  %v3111_v47 = vsel %vm1000_vm2, %v4915_v41, 0.0 }
 0x77b   :  { %3112 = vadd.xlane.f32.xlu0 %v3111_v47 }
 0x780   :  { %v4917_v59 = vpop.eup %4916 }
 0x781   :  { %v4919_v0 = vpop.eup %4918  ;;  %v3120_v1 = vsel %vm1000_vm2, %v4917_v59, 0.0 }
 0x782   :  { %3121 = vadd.xlane.f32.xlu1 %v3120_v1  ;;  %v3117_v6 = vsel %vm1000_vm2, %v4919_v0, 0.0  ;;  %v3785_v1 = vld [vmem:[%s5823_s10] sm:$0xff] }
 0x783   :  { %3118 = vadd.xlane.f32.xlu0 %v3117_v6  ;;  %v3787_v6 = vld [vmem:[%s5823_s10 + $0x10] sm:$0xff] }
 0x787   :  { %3744 = vadd.xlane.f32.xlu0 %v3743_v16  ;;  %v4848_v16 = vpack.c.bf16 %v3788_v7, %v3787_v6 }
 0x807   :  { %v3116_v22 = vpop.xlane.xlu1 %3115 }
 0x808   :  { %4920 = vrcp.f32 %v3116_v22  ;;  %v3113_v53 = vpop.xlane.xlu0 %3112  ;;  %v3879_v22 = vld [vmem:[%s5825_s12] sm:$0xff] }
 0x809   :  { %4922 = vrcp.f32 %v3113_v53  ;;  %v3880_v53 = vld [vmem:[%s5825_s12 + $0x8] sm:$0xff] }
 0x80f   :  { %v3122_v26 = vpop.xlane.xlu1 %3121 }
 0x810   :  { %4924 = vrcp.f32 %v3122_v26  ;;  %v3119_v29 = vpop.xlane.xlu0 %3118  ;;  %v3881_v26 = vld [vmem:[%s5825_s12 + $0x10] sm:$0xff] }
 0x811   :  { %4926 = vrcp.f32 %v3119_v29  ;;  %v4852_v29 = vpack.c.bf16 %v3880_v53, %v3879_v22 }
 0x812   :  { %v4921_v35 = vpop.eup %4920 }
 0x813   :  { %v4923_v37 = vpop.eup %4922  ;;  %v3128_v38 = vmul.f32 %v4921_v35, %v4913_v40  ;;  %v3882_v35 = vld [vmem:[%s5825_s12 + $0x18] sm:$0xff] }
 0x814   :  { %v3127_v39 = vmul.f32 %v4923_v37, %v4915_v41  ;;  %v3745_v42 = vpop.xlane.xlu0 %3744  ;;  %v4856_v37 = vpack.c.bf16 %v3882_v35, %v3881_v26 }
 0x815   :  { %3727 = vst.msk [vmem:[#allocation4 + $0x28] sm:$0xff] %vm1000_vm2, %v3128_v38  ;;  %v3749_v43 = vmul.f32 0.03125, %v3745_v42  ;;  %4622 = vmatmul.mubr.msk.f32.vlgmr.msra.gmra.mrb[36].mxu1 %vm1000_vm2, %v3128_v38  ;;  %v3883_v38 = vld [vmem:[%s5825_s12 + $0x20] sm:$0xff] }
 0x816   :  { %3726 = vst.msk [vmem:[#allocation4 + $0x20] sm:$0xff] %vm1000_vm2, %v3127_v39  ;;  %4617 = vmatmul.mubr.msk.f32.vlgmr.msra.gmra.mrb[44].mxu0 %vm1000_vm2, %v3127_v39  ;;  %4630 = vmatpush3.msra.mxu1 %v5619_v49  ;;  %v3884_v39 = vld [vmem:[%s5825_s12 + $0x28] sm:$0xff] }
 0x817   :  { %v3751_v44 = vsub.f32 %v5645_v15, %v3749_v43  ;;  %4625 = vmatpush3.msra.mxu0 %v5621_v50  ;;  %4626 = vmatprep.mubr.msk.f32.mxu0 %vm4982_vm1, %v4983_v20  ;;  %v4860_v42 = vpack.c.bf16 %v3884_v39, %v3883_v38  ;;  %v3885_v43 = vld [vmem:[%s5825_s12 + $0x30] sm:$0xff] }
 0x818   :  { %4631 = vmatprep.mubr.msk.f32.mxu1 %vm4982_vm1, %v4983_v20  ;;  %4634 = vmatprep.subr.mxu0 %v4983_v20 }
 0x819   :  { %v3753_v45 = vmul.f32 %v3751_v44, %v3751_v44  ;;  %4639 = vmatprep.subr.mxu1 %v4983_v20 }
 0x81a   :  { %v4925_v48 = vpop.eup %4924 }
 0x81b   :  { %v4927_v51 = vpop.eup %4926  ;;  %v3130_v4 = vmul.f32 %v4925_v48, %v4917_v59  ;;  %v3755_v49 = vsel %vm55_vm0, %v3753_v45, 0.0  ;;  %v3887_v48 = vld [vmem:[%s5825_s12 + $0x40] sm:$0xff] }
 0x81c   :  { %v3129_v54 = vmul.f32 %v4927_v51, %v4919_v0  ;;  %3756 = vadd.xlane.f32.xlu0 %v3755_v49  ;;  %v3888_v51 = vld [vmem:[%s5825_s12 + $0x48] sm:$0xff]  ;;  %v3889_v49 = vld [vmem:[%s5825_s12 + $0x50] sm:$0xff] }
 0x81d   :  { %3729 = vst.msk [vmem:[#allocation4 + $0x38] sm:$0xff] %vm1000_vm2, %v3130_v4  ;;  %4632 = vmatmul.mubr.msk.f32.vlgmr.msra.gmra.mrb[38].mxu1 %vm1000_vm2, %v3130_v4  ;;  %v4868_v4 = vpack.c.bf16 %v3888_v51, %v3887_v48 }
 0x81e   :  { %3728 = vst.msk [vmem:[#allocation4 + $0x30] sm:$0xff] %vm1000_vm2, %v3129_v54  ;;  %4627 = vmatmul.mubr.msk.f32.vlgmr.msra.gmra.mrb[46].mxu0 %vm1000_vm2, %v3129_v54  ;;  %4640 = vmatpush3.msra.mxu1 %v5461_v56  ;;  %v3890_v54 = vld [vmem:[%s5825_s12 + $0x58] sm:$0xff] }
 0x81f   :  { %4635 = vmatpush3.msra.mxu0 %v5454_v61  ;;  %4636 = vmatprep.mubr.msk.f32.mxu0 %vm4982_vm1, %v4983_v20 }
 0x820   :  { %4641 = vmatprep.mubr.msk.f32.mxu1 %vm4982_vm1, %v4983_v20  ;;  %4644 = vmatprep.subr.mxu0 %v4983_v20 }
 0x821   :  { %4649 = vmatprep.subr.mxu1 %v4983_v20 }
 0x8a9   :  { %v3757_v50 = vpop.xlane.xlu0 %3756 }
 0x8aa   :  { %v3761_v36 = vmul.f32 0.03125, %v3757_v50  ;;  %v4872_v50 = vpack.c.bf16 %v3890_v54, %v3889_v49 }
 0x8ac   :  { %v3763_v55 = vadd.f32 1e-05, %v3761_v36  ;;  %v3891_v36 = vld [vmem:[%s5825_s12 + $0x60] sm:$0xff] }
 0x8ae   :  { %4928 = vrsqrt.f32 %v3763_v55  ;;  %v3892_v55 = vld [vmem:[%s5825_s12 + $0x68] sm:$0xff] }
 0x8b8   :  { %v4929_v57 = vpop.eup %4928 }
 0x8b9   :  { %v3767_v61 = vmul.f32 %v4929_v57, %v3751_v44  ;;  %v3886_v44 = vld [vmem:[%s5825_s12 + $0x38] sm:$0xff]  ;;  %v4876_v57 = vpack.c.bf16 %v3892_v55, %v3891_v36 }
 0x8ba   :  { %v4864_v45 = vpack.c.bf16 %v3886_v44, %v3885_v43 }
 0x8bb   :  { %v3775_v8 = vmul.f32 %v5681_v3, %v3767_v61 }
 0x8e8   :  { %v3273_v60 = vpop.f32.mrb[36].mxu1 }
 0x8e9   :  { %v3200_v62 = vpop.f32.mrb[44].mxu0  ;;  %v4623_v56 = vpop.f32.mrb[37].mxu1  ;;  %4642 = vmatmul.mubr.msk.f32.vlgmr.msra.gmra.mrb[40].mxu1 %vm1000_vm2, %v3273_v60 }
 0x8ea   :  { %v4618_v2 = vpop.f32.mrb[45].mxu0  ;;  %4637 = vmatmul.mubr.msk.f32.vlgmr.msra.gmra.mrb[48].mxu0 %vm1000_vm2, %v3200_v62  ;;  %4650 = vmatpush3.msra.mxu1 %v5477_v5 }
 0x8eb   :  { %4645 = vmatpush3.msra.mxu0 %v5468_v63  ;;  %4646 = vmatprep.mubr.msk.f32.mxu0 %vm4982_vm1, %v4983_v20  ;;  %v3783_v63 = vadd.f32 %v5692_v9, %v3775_v8 }
 0x8ec   :  { %4651 = vmatprep.mubr.msk.f32.mxu1 %vm4982_vm1, %v4983_v20  ;;  %4853 = vmatprep.subr.bf16.mxu1 %v4852_v29 }
 0x8f0   :  { %v3419_v5 = vpop.f32.mrb[38].mxu1 }
 0x8f1   :  { %v3346_v11 = vpop.f32.mrb[46].mxu0  ;;  %v4633_v14 = vpop.f32.mrb[39].mxu1  ;;  %4652 = vmatmul.mubr.msk.f32.vlgmr.msra.gmra.mrb[42].mxu1 %vm1000_vm2, %v3419_v5 }
 0x8f2   :  { %v4628_v18 = vpop.f32.mrb[47].mxu0  ;;  %4647 = vmatmul.mubr.msk.f32.vlgmr.msra.gmra.mrb[50].mxu0 %vm1000_vm2, %v3346_v11  ;;  %4855 = vmatpush3.bf16.msra.mxu1 %v4852_v29  ;;  %v3893_v11 = vld [vmem:[%s5825_s12 + $0x70] sm:$0xff]  ;;  %v3894_v14 = vld [vmem:[%s5825_s12 + $0x78] sm:$0xff] }
 0x8f3   :  { %4662 = vmatprep.mubr.msk.f32.mxu0 %vm55_vm0, %v3783_v63  ;;  %4857 = vmatprep.subr.bf16.mxu1 %v4856_v37  ;;  %v4880_v63 = vpack.c.bf16 %v3894_v14, %v3893_v11  ;;  %v4074_v18 = vld [vmem:[%s5824_s11] ss:$0 sm:$0xff] }
 0x8f6   :  { %4859 = vmatpush3.bf16.msra.mxu1 %v4856_v37 }
 0x8f7   :  { %4861 = vmatprep.subr.bf16.mxu1 %v4860_v42 }
 0x8fa   :  { %4863 = vmatpush3.bf16.msra.mxu1 %v4860_v42 }
 0x8fb   :  { %4865 = vmatprep.subr.bf16.mxu1 %v4864_v45 }
 0x8fe   :  { %4867 = vmatpush3.bf16.msra.mxu1 %v4864_v45 }
 0x8ff   :  { %4869 = vmatprep.subr.bf16.mxu1 %v4868_v4 }
 0x902   :  { %4871 = vmatpush3.bf16.msra.mxu1 %v4868_v4 }
 0x903   :  { %4873 = vmatprep.subr.bf16.mxu1 %v4872_v50 }
 0x906   :  { %4875 = vmatpush3.bf16.msra.mxu1 %v4872_v50 }
 0x907   :  { %4877 = vmatprep.subr.bf16.mxu1 %v4876_v57 }
 0x90a   :  { %4879 = vmatpush3.bf16.msra.mxu1 %v4876_v57 }
 0x90b   :  { %4881 = vmatprep.subr.bf16.mxu1 %v4880_v63 }
 0x90e   :  { %4883 = vmatpush3.bf16.msra.mxu1 %v4880_v63 }
 0x9bc   :  { %v3565_v20 = vpop.f32.mrb[40].mxu1 }
 0x9bd   :  { %v3492_v21 = vpop.f32.mrb[48].mxu0  ;;  %v3716_v27 = vsel %vm55_vm0, %v3565_v20, 0.0  ;;  %v4643_v28 = vpop.f32.mrb[41].mxu1 }
 0x9be   :  { %v3715_v30 = vsel %vm55_vm0, %v3492_v21, 0.0  ;;  %v4638_v32 = vpop.f32.mrb[49].mxu0 }
 0x9bf   :  { %v3717_v10 = vadd.f32 %v3716_v27, %v3715_v30 }
 0x9c4   :  { %v3711_v12 = vpop.f32.mrb[42].mxu1 }
 0x9c5   :  { %v3638_v13 = vpop.f32.mrb[50].mxu0  ;;  %v4653_v17 = vpop.f32.mrb[43].mxu1  ;;  %v3720_v33 = vsel %vm55_vm0, %v3711_v12, 0.0 }
 0x9c6   :  { %v3718_v19 = vsel %vm55_vm0, %v3638_v13, 0.0  ;;  %v4648_v25 = vpop.f32.mrb[51].mxu0 }
 0x9c7   :  { %v3719_v31 = vadd.f32 %v3718_v19, %v3717_v10 }
 0x9c9   :  { %v3721_v23 = vadd.f32 %v3720_v33, %v3719_v31 }
 0x9cb   :  { %v3738_v34 = vadd.f32 %v5636_v52, %v3721_v23 }
 0x9cd   :  { %v5704_v40 = vadd.f32 %v3738_v34, %v5424_v24  ;;  %v3786_v24 = vld [vmem:[%s5823_s10 + $0x8] sm:$0xff]  ;;  %s4985_s10 = smov [#allocation4]  }
 0x9ce   :  { %v4844_v52 = vpack.c.bf16 %v3786_v24, %v3785_v1  ;;  %s3998_s3 = sshll.u32 %s4985_s10, 4  ;;  %s3999_s3 = int_to_ptr.vmem [resolvable:$true] %s3998_s3 }
 0x9cf   :  { %v3746_v41 = vsel %vm55_vm0, %v5704_v40, 0.0  ;;  %s4933_s6 = scalar_lea.vmem %s3999_s3, 1024  ;;  %p4938_p1 = scmp.lt.s32.totalorder %s3999_s3, %s3999_s3 }
 0x9d0   :  { %3747 = vadd.xlane.f32.xlu1 %v3746_v41  ;;  %4845 = vmatprep.subr.bf16.mxu0 %v4844_v52  ;;  %p4934_p0 = scmp.ne.s32.totalorder %s3999_s3, %s4933_s6  ;;  %p4939_p2 = scmp.lt.s32.totalorder %s4933_s6, %s4933_s6 }
 0x9d1   :  { %4847 = vmatpush3.bf16.msra.mxu0 %v4844_v52 }
 0x9d2   :  { %4849 = vmatprep.subr.bf16.mxu0 %v4848_v16  ;;  %p4940_p3 = por %p4939_p2, %p4938_p1 }
 0x9d4   :  { %p4941_p4 = pnand %p4940_p3, %p4934_p0 }
 0x9d5   :  { %4851 = vmatpush3.bf16.msra.mxu0 %v4848_v16 }
 0xa5d   :  { %v3748_v46 = vpop.xlane.xlu1 %3747 }
 0xa5e   :  { %v3750_v47 = vmul.f32 0.03125, %v3748_v46 }
 0xa60   :  { %v3752_v58 = vsub.f32 %v5704_v40, %v3750_v47 }
 0xa62   :  { %v3754_v59 = vmul.f32 %v3752_v58, %v3752_v58 }
 0xa64   :  { %v3758_v0 = vsel %vm55_vm0, %v3754_v59, 0.0 }
 0xa65   :  { %3759 = vadd.xlane.f32.xlu1 %v3758_v0 }
 0xaf2   :  { %v3760_v60 = vpop.xlane.xlu1 %3759 }
 0xaf3   :  { %v3762_v62 = vmul.f32 0.03125, %v3760_v60 }
 0xaf5   :  { %v3764_v56 = vadd.f32 1e-05, %v3762_v62 }
 0xaf7   :  { %4930 = vrsqrt.f32 %v3764_v56 }
 0xb01   :  { %v4931_v61 = vpop.eup %4930 }
 0xb02   :  { %v3768_v2 = vmul.f32 %v4931_v61, %v3752_v58 }
 0xb04   :  { %v3776_v8 = vmul.f32 %v5681_v3, %v3768_v2 }
 0xb06   :  { %v3784_v5 = vadd.f32 %v5692_v9, %v3776_v8 }
 0xb08   :  { %4663 = vmatmul.mubr.msk.f32.vlgmr.msra.gmra.mrb[52].mxu0 %vm55_vm0, %v3784_v5 }
 0xbdb   :  { %v4664_v3 = vpop.f32.mrb[52].mxu0 }
 0xbdc   :  { %v3874_v20 = vadd.f32 %v4664_v3, %v4074_v18  ;;  %v3868_v9 = vpop.f32.mrb[53].mxu0 }
 0xbdd   :  { %v3869_v21 = vadd.f32 %v4074_v18, %v3868_v9 }
 0xbde   :  { %v3878_v28 = vmax.f32 %v3874_v20, 0.0 }
 0xbdf   :  { %v3877_v27 = vmax.f32 %v3869_v21, 0.0 }
 0xbe1   :  { %4697 = vmatprep.mubr.f32.mxu1 %v3877_v27 }
 0xbe2   :  { %4698 = vmatmul.mubr.f32.vlgmr.msra.gmra.mrb[44].mxu1 %v3878_v28 }
 0xbe3   :  { %4944 = shalt.err (!%p4941_p4)
}
 0xbe4   :  { %s4945_s23 = scalar_lea.hbm %s5828_s15, 1024 }
 0xbe5   :  { %p4946_p5 = scmp.ne.s32.totalorder %s5828_s15, %s4945_s23  ;;  %p4949_p6 = scmp.lt.u32.totalorder %s4945_s23, %s5828_s15 }
 0xbe7   :  { %p4951_p7 = pnand %p4949_p6, %p4946_p5 }
 0xbe9   :  { %4954 = shalt.err (!%p4951_p7)
}
 0xbea   :  { %s4986_s26 = smov 128   ;;  %s4987_s27 = smov 8   ;;  %v4077_v30 = vld [vmem:[%s5826_s13] ss:$0 sm:$0xff] }
 0xbeb   :  { %4004 = dma.vmem_to_hbm [thread:$0]  %s3999_s3, 1024, %s5828_s15, [#allocation5], %s4986_s26, %s4986_s26, %s4987_s27  }
 0xbec   :  { %s4988_s30 = smov [#allocation2]  }
 0xbed   :  { %s3986_s16 = sshll.u32 %s4988_s30, 4  ;;  %s3987_s16 = int_to_ptr.vmem [resolvable:$true] %s3986_s16 }
 0xbee   :  { %s4955_s15 = scalar_lea.vmem %s3987_s16, 256  ;;  %p4960_p9 = scmp.lt.s32.totalorder %s3987_s16, %s3987_s16 }
 0xbef   :  { %p4956_p8 = scmp.ne.s32.totalorder %s3987_s16, %s4955_s15  ;;  %p4961_p10 = scmp.lt.s32.totalorder %s4955_s15, %s4955_s15 }
 0xbf1   :  { %p4962_p11 = por %p4961_p10, %p4960_p9 }
 0xbf3   :  { %p4963_p12 = pnand %p4962_p11, %p4956_p8 }
 0xcb5   :  { %v4699_v32 = vpop.f32.mrb[44].mxu1 }
 0xcb6   :  { %v3974_v10 = vadd.f32 %v4699_v32, %v4077_v30  ;;  %v3968_v12 = vpop.f32.mrb[45].mxu1 }
 0xcb7   :  { %v3969_v13 = vadd.f32 %v4077_v30, %v3968_v12 }
 0xcb8   :  { %v3978_v17 = vadd.f32 %v3974_v10, %v5704_v40 }
 0xcb9   :  { %v3977_v19 = vadd.f32 %v3969_v13, %v5645_v15 }
 0xcba   :  { %3980 = vst.msk [vmem:[#allocation2 + $0x8] sm:$0xff] %vm55_vm0, %v3978_v17 }
 0xcbb   :  { %3979 = vst.msk [vmem:[#allocation2] sm:$0xff] %vm55_vm0, %v3977_v19 }
 0xcbc   :  { %4966 = shalt.err (!%p4963_p12)
}
 0xcbd   :  { %s4967_s5 = scalar_lea.hbm %s5827_s14, 256 }
 0xcbe   :  { %p4968_p13 = scmp.ne.s32.totalorder %s5827_s14, %s4967_s5  ;;  %p4971_p0 = scmp.lt.u32.totalorder %s4967_s5, %s5827_s14 }
 0xcc0   :  { %p4973_p1 = pnand %p4971_p0, %p4968_p13 }
 0xcc2   :  { %4976 = shalt.err (!%p4973_p1)
}
 0xcc3   :  { %3992 = dma.vmem_to_hbm [thread:$0]  %s3987_s16, 256, %s5827_s14, [#allocation3], %s4986_s26, %s4986_s26, %s4987_s27  }
 0xcc4   :  { %4977 = dma.done.wait [#allocation3], 256  }
 0xcc5   :  { %4978 = vsyncadd [#allocation3], 4294967040 }
 0xcc6   :  { %4979 = dma.done.wait [#allocation5], 1024  }
 0xcc7   :  { %4980 = vsyncadd [#allocation5], 4294966272 }
 0xcc8   :  { %4011 = vsyncpa [#allocation3], 1 }
 0xcc9   :  { %4012 = vsyncpa [#allocation5], 1 }

</bundles_post_ra>
